<compile_context>
chip_gen: v5e
topology: v5e:2x2
jax: 0.10.0
libtpu: 0.0.40
codegen_flags: <defaults>
</compile_context>

<pallas_src>
import random

import jax
import jax.numpy as jnp
from jax.experimental import pallas as pl
from jax.experimental.pallas import tpu as pltpu


def _slab_layout(D):
    """Row offsets of each fused parameter inside the (rows, 4D) slab.
    Every piece starts on an 8-sublane boundary so static slices never cross
    a (8,128) tile boundary."""
    assert D % 8 == 0, "D must be a multiple of 8 for sublane alignment"
    L = 4 * D
    r_th2 = 0                  # theta2            (1, L)  [lanes 0:D used]
    r_wsf = 8                  # [W_hr|W_hz|W_hn|theta3]^fused   (D, L)
    r_bsf = r_wsf + D          # [b_hr|b_hz|b_hn|0]              (1, L)
    r_wxf = r_bsf + 8          # [W_ir|W_iz|W_in|0]              (D, L)
    r_bxf = r_wxf + D          # [b_ir|b_iz|b_in|0]              (1, L)
    r_wc = r_bxf + 8           # classifier W^T padded           (L, L)
    r_bc = r_wc + L            # classifier bias padded          (1, L)
    rows = r_bc + 8
    return dict(L=L, r_th2=r_th2, r_wsf=r_wsf, r_bsf=r_bsf, r_wxf=r_wxf,
                r_bxf=r_bxf, r_wc=r_wc, r_bc=r_bc, rows=rows)


def prepare_params(theta2, theta3, w_ih, w_hh, b_ih, b_hh, w_cls, b_cls):
    """Fuse + pad the PyTorch-layout parameters into ONE lane-dense f32 slab."""
    D = theta3.shape[0]
    lay = _slab_layout(D)
    L = lay["L"]
    C = w_cls.shape[0]
    f32 = jnp.float32

    # s-side (hidden) fused weight: columns [W_hr^T | W_hz^T | W_hn^T | theta3]
    w_sf = jnp.concatenate(
        [w_hh[0:D].T, w_hh[D:2 * D].T, w_hh[2 * D:3 * D].T, theta3], axis=1).astype(f32)
    b_sf = jnp.concatenate([b_hh, jnp.zeros((D,), f32)]).reshape(1, L).astype(f32)

    # x-side (input) fused weight padded to full 128 lanes: [W_ir^T|W_iz^T|W_in^T|0]
    w_xf = jnp.concatenate(
        [w_ih[0:D].T, w_ih[D:2 * D].T, w_ih[2 * D:3 * D].T, jnp.zeros((D, D), f32)],
        axis=1).astype(f32)
    b_xf = jnp.concatenate([b_ih, jnp.zeros((D,), f32)]).reshape(1, L).astype(f32)

    # classifier over concat([s, x, |s-x|, s*x]); columns padded to 128 lanes.
    wc = jnp.zeros((L, L), f32).at[:, 0:C].set(w_cls.T.astype(f32))
    b_c = jnp.zeros((1, L), f32).at[0, 0:C].set(b_cls.astype(f32))

    th2 = jnp.zeros((1, L), f32).at[:, 0:D].set(theta2.astype(f32))

    def pad_rows(x, rows):
        return jnp.concatenate([x, jnp.zeros((rows - x.shape[0], L), f32)], axis=0)

    slab = jnp.concatenate([
        pad_rows(th2, lay["r_wsf"] - lay["r_th2"]),
        w_sf,
        pad_rows(b_sf, lay["r_wxf"] - lay["r_bsf"]),
        w_xf,
        pad_rows(b_xf, lay["r_wc"] - lay["r_bxf"]),
        wc,
        pad_rows(b_c, lay["rows"] - lay["r_bc"]),
    ], axis=0)
    assert slab.shape == (lay["rows"], L)
    return slab


def make_answer_kernel(step, num_class, D):
    """Kernel body. Only shapes/step/num_class are static; the prediction-dropout
    mask arrives at runtime through the SMEM step-weight vector."""
    lay = _slab_layout(D)
    L = lay["L"]

    def kernel(step_w_ref,        # SMEM (step,) f32: per-step accumulation weight
               m_p_ref, m_h_ref,  # VMEM (B, Lp, D), (B, Lh, D)
               slab_ref,          # VMEM (rows, 4D) fused parameter slab
               out_ref):          # VMEM (B, C)
        # ---- hoisted loads (once; static, 8-aligned slab slices) ----
        m_p = m_p_ref[...]
        m_h = m_h_ref[...]
        th2 = slab_ref[lay["r_th2"]:lay["r_th2"] + 1, :][:, 0:D]          # (1, D)
        w_sf = slab_ref[lay["r_wsf"]:lay["r_wsf"] + D, :]                 # (D, 4D)
        b_sf = slab_ref[lay["r_bsf"]:lay["r_bsf"] + 1, :]                 # (1, 4D)
        w_xf = slab_ref[lay["r_wxf"]:lay["r_wxf"] + D, :]                 # (D, 4D)
        b_xf = slab_ref[lay["r_bxf"]:lay["r_bxf"] + 1, :]                 # (1, 4D)
        wc = slab_ref[lay["r_wc"]:lay["r_wc"] + L, :]                     # (4D, 4D)
        b_c = slab_ref[lay["r_bc"]:lay["r_bc"] + 1, :]                    # (1, 4D)

        B = m_p.shape[0]

        # ---- s_0 = softmax(theta_2 @ m_h^T) @ m_h : VPU mul + XLU reduce,
        #      denominator applied as a post-scale after the weighted sum. ----
        scores_h = jnp.sum(th2 * m_h, axis=-1)                            # (B, Lh)
        e0 = jnp.exp(scores_h - jnp.max(scores_h, axis=-1, keepdims=True))
        s_num = jnp.sum(e0[:, :, None] * m_h, axis=1)                     # (B, D)
        s_t = s_num * (1.0 / jnp.sum(e0, axis=-1, keepdims=True))         # (B, D)

        acc_s = jnp.zeros((B, D), jnp.float32)
        acc_x = jnp.zeros((B, D), jnp.float32)
        acc_a = jnp.zeros((B, D), jnp.float32)
        acc_m = jnp.zeros((B, D), jnp.float32)

        # `step` is a small static int -> unrolled Python loop.
        for i in range(step):
            w_i = step_w_ref[i]

            # One lane-dense (B,D)@(D,4D) dot: 3 GRU hidden gates + theta3
            # (hidden-side biases folded in).  Gate slices are lane-aligned
            # with x_proj below.
            s_proj = jnp.dot(s_t, w_sf, preferred_element_type=jnp.float32) + b_sf
            tmp = s_proj[:, 3 * D:4 * D]                                   # s_t @ theta3

            # ---- beta attention over m_p: VPU mul + XLU reduce,
            #      softmax denominator post-scaled (off the critical path). ----
            scores = jnp.sum(tmp[:, None, :] * m_p, axis=-1)               # (B, Lp)
            e = jnp.exp(scores - jnp.max(scores, axis=-1, keepdims=True))
            x_num = jnp.sum(e[:, :, None] * m_p, axis=1)                   # (B, D)
            # TODO(synk): pl.reciprocal(sum_e, approx=True) on EUP once the
            # 1e-4 tolerance is re-validated through the recurrence.
            x_t = x_num * (1.0 / jnp.sum(e, axis=-1, keepdims=True))       # (B, D)

            # One lane-dense N=128 (B,D)@(D,4D) dot: 3 GRU input gates (+b_ih).
            x_proj = jnp.dot(x_t, w_xf, preferred_element_type=jnp.float32) + b_xf

            # ---- GRUCell(x_t, s_t): PyTorch semantics; aligned gate slices ----
            r = jax.nn.sigmoid(x_proj[:, 0:D] + s_proj[:, 0:D])
            z = jax.nn.sigmoid(x_proj[:, D:2 * D] + s_proj[:, D:2 * D])
            n = jnp.tanh(x_proj[:, 2 * D:3 * D] + r * s_proj[:, 2 * D:3 * D])
            s_t = (1.0 - z) * n + z * s_t

            # Classifier deferred: only accumulate step-weighted features.
            acc_s = acc_s + w_i * s_t
            acc_x = acc_x + w_i * x_t
            acc_a = acc_a + w_i * jnp.abs(s_t - x_t)
            acc_m = acc_m + w_i * (s_t * x_t)

        # ---- single classifier dot after the loop (linear in the features) ----
        w_sum = step_w_ref[0]
        for i in range(1, step):
            w_sum = w_sum + step_w_ref[i]
        feat = jnp.concatenate([acc_s, acc_x, acc_a, acc_m], axis=1)       # (B, 4D)
        logits = jnp.dot(feat, wc, preferred_element_type=jnp.float32) + w_sum * b_c
        out_ref[...] = logits[:, 0:num_class]

    return kernel


def answer_module_forward(m_p, m_h, slab, step_weights, step, num_class):
    B, _, D = m_p.shape
    kernel = make_answer_kernel(step, num_class, D)
    smem = pl.BlockSpec(memory_space=pltpu.MemorySpace.SMEM)
    vmem = pl.BlockSpec(memory_space=pltpu.MemorySpace.VMEM)
    # Single invocation (no grid): at B=2 a batch grid axis would only add
    # per-step launch overhead; revisit with dimension_semantics=("parallel",)
    # once each core would receive >= 8 batch rows.
    return pl.pallas_call(
        kernel,
        out_shape=jax.ShapeDtypeStruct((B, num_class), jnp.float32),
        in_specs=[smem, vmem, vmem, vmem],
        out_specs=vmem,
    )(step_weights, m_p, m_h, slab)


def reference_forward(m_p, m_h, raw, step, step_weights):
    """Pure-JAX reference mirroring the PyTorch forward (same step weights)."""
    theta2, theta3 = raw["theta2"], raw["theta3"]
    w_ih, w_hh, b_ih, b_hh = raw["w_ih"], raw["w_hh"], raw["b_ih"], raw["b_hh"]
    w_cls, b_cls = raw["w_cls"], raw["b_cls"]
    D = theta3.shape[0]
    alpha = jax.nn.softmax(jnp.einsum("d,bld->bl", theta2[0], m_h), axis=-1)
    s_t = jnp.einsum("bl,bld->bd", alpha, m_h)
    acc = jnp.zeros((m_p.shape[0], w_cls.shape[0]), jnp.float32)
    for i in range(step):
        tmp = s_t @ theta3
        beta = jax.nn.softmax(jnp.einsum("bd,bld->bl", tmp, m_p), axis=-1)
        x_t = jnp.einsum("bl,bld->bd", beta, m_p)
        gi = x_t @ w_ih.T + b_ih
        gh = s_t @ w_hh.T + b_hh
        r = jax.nn.sigmoid(gi[:, 0:D] + gh[:, 0:D])
        z = jax.nn.sigmoid(gi[:, D:2 * D] + gh[:, D:2 * D])
        n = jnp.tanh(gi[:, 2 * D:3 * D] + r * gh[:, 2 * D:3 * D])
        s_t = (1.0 - z) * n + z * s_t
        feat = jnp.concatenate([s_t, x_t, jnp.abs(s_t - x_t), s_t * x_t], axis=1)
        acc = acc + step_weights[i] * (feat @ w_cls.T + b_cls)
    return acc


def make_step_weights(step, prediction_dropout, seed):
    """Reproduce the module's host-side random.sample prediction dropout as a
    per-step weight vector (0 or 1/|included|). Passed dynamically -> no recompile."""
    rng = random.Random(seed)
    included_num = max(1, step - int(step * prediction_dropout))
    included = set(rng.sample(range(step), included_num))
    return jnp.array([1.0 / included_num if i in included else 0.0 for i in range(step)],
                     dtype=jnp.float32)


if __name__ == "__main__":
    hidden_size = 16
    D = 2 * hidden_size          # 32
    step = 5
    num_class = 4
    prediction_dropout = 0.2
    B, Lp, Lh = 2, 10, 8

    key = jax.random.PRNGKey(0)
    ks = jax.random.split(key, 10)

    m_p = jax.random.normal(ks[0], (B, Lp, D), jnp.float32)
    m_h = jax.random.normal(ks[1], (B, Lh, D), jnp.float32)

    # Synthetic deterministic parameters (PyTorch module shapes).
    raw = dict(
        theta2=jax.random.normal(ks[2], (1, D), jnp.float32),
        theta3=jax.random.normal(ks[3], (D, D), jnp.float32) * 0.1,
        w_ih=jax.random.normal(ks[4], (3 * D, D), jnp.float32) * 0.1,   # GRUCell weight_ih
        w_hh=jax.random.normal(ks[5], (3 * D, D), jnp.float32) * 0.1,   # GRUCell weight_hh
        b_ih=jax.random.normal(ks[6], (3 * D,), jnp.float32) * 0.1,
        b_hh=jax.random.normal(ks[7], (3 * D,), jnp.float32) * 0.1,
        w_cls=jax.random.normal(ks[8], (num_class, 4 * D), jnp.float32) * 0.1,  # Linear(8H,C)
        b_cls=jax.random.normal(ks[9], (num_class,), jnp.float32) * 0.1,
    )
    slab = prepare_params(**raw)

    # Two different random dropout draws exercise the dynamic mask (same compile).
    for seed in (0, 1):
        step_weights = make_step_weights(step, prediction_dropout, seed)
        out = answer_module_forward(m_p, m_h, slab, step_weights, step, num_class)
        out = jax.block_until_ready(out)
        ref = reference_forward(m_p, m_h, raw, step, step_weights)
        assert out.shape == (B, num_class)
        assert jnp.allclose(out, ref, atol=1e-4, rtol=1e-4), (seed, out, ref)

    print("KERNEL_OK")
</pallas_src>

<mosaic_0001>
module attributes {stable_mosaic.version = 11 : i64} {
  func.func @kernel(%arg0: memref<5xf32, #tpu.memory_space<smem>>, %arg1: memref<2x10x32xf32, #tpu.memory_space<vmem>>, %arg2: memref<2x8x32xf32, #tpu.memory_space<vmem>>, %arg3: memref<224x128xf32, #tpu.memory_space<vmem>>, %arg4: memref<2x4xf32, #tpu.memory_space<vmem>>) attributes {dimension_semantics = [], scalar_prefetch = 0 : i64, scratch_operands = 0 : i64, tpu.core_type = #tpu.core_type<tc>} {
    %c0 = arith.constant 0 : index
    %c0_0 = arith.constant 0 : index
    %c0_1 = arith.constant 0 : index
    %0 = vector.load %arg1[%c0, %c0_0, %c0_1] : memref<2x10x32xf32, #tpu.memory_space<vmem>>, vector<2x10x32xf32>
    %c0_2 = arith.constant 0 : index
    %c0_3 = arith.constant 0 : index
    %c0_4 = arith.constant 0 : index
    %1 = vector.load %arg2[%c0_2, %c0_3, %c0_4] : memref<2x8x32xf32, #tpu.memory_space<vmem>>, vector<2x8x32xf32>
    %c0_5 = arith.constant 0 : index
    %c0_6 = arith.constant 0 : index
    %2 = vector.load %arg3[%c0_5, %c0_6] : memref<224x128xf32, #tpu.memory_space<vmem>>, vector<1x128xf32>
    %3 = vector.extract_strided_slice %2 {offsets = [0, 0], sizes = [1, 32], strides = [1, 1]} : vector<1x128xf32> to vector<1x32xf32>
    %c8 = arith.constant 8 : index
    %c0_7 = arith.constant 0 : index
    %4 = vector.load %arg3[%c8, %c0_7] : memref<224x128xf32, #tpu.memory_space<vmem>>, vector<32x128xf32>
    %c40 = arith.constant 40 : index
    %c0_8 = arith.constant 0 : index
    %5 = vector.load %arg3[%c40, %c0_8] : memref<224x128xf32, #tpu.memory_space<vmem>>, vector<1x128xf32>
    %c48 = arith.constant 48 : index
    %c0_9 = arith.constant 0 : index
    %6 = vector.load %arg3[%c48, %c0_9] : memref<224x128xf32, #tpu.memory_space<vmem>>, vector<32x128xf32>
    %c80 = arith.constant 80 : index
    %c0_10 = arith.constant 0 : index
    %7 = vector.load %arg3[%c80, %c0_10] : memref<224x128xf32, #tpu.memory_space<vmem>>, vector<1x128xf32>
    %c88 = arith.constant 88 : index
    %c0_11 = arith.constant 0 : index
    %8 = vector.load %arg3[%c88, %c0_11] : memref<224x128xf32, #tpu.memory_space<vmem>>, vector<128x128xf32>
    %c216 = arith.constant 216 : index
    %c0_12 = arith.constant 0 : index
    %9 = vector.load %arg3[%c216, %c0_12] : memref<224x128xf32, #tpu.memory_space<vmem>>, vector<1x128xf32>
    %10 = vector.shape_cast %3 : vector<1x32xf32> to vector<1x1x32xf32>
    %11 = vector.broadcast %10 : vector<1x1x32xf32> to vector<2x8x32xf32>
    %12 = arith.mulf %11, %1 : vector<2x8x32xf32>
    %cst = arith.constant dense<0.000000e+00> : vector<2x8xf32>
    %13 = vector.multi_reduction <add>, %12, %cst [2] : vector<2x8x32xf32> to vector<2x8xf32>
    %cst_13 = arith.constant dense<0xFF800000> : vector<2xf32>
    %14 = vector.multi_reduction <maximumf>, %13, %cst_13 [1] : vector<2x8xf32> to vector<2xf32>
    %15 = vector.shape_cast %14 : vector<2xf32> to vector<2x1xf32>
    %16 = vector.broadcast %15 : vector<2x1xf32> to vector<2x8xf32>
    %17 = arith.subf %13, %16 : vector<2x8xf32>
    %18 = math.exp %17 : vector<2x8xf32>
    %19 = vector.shape_cast %18 : vector<2x8xf32> to vector<2x8x1xf32>
    %20 = vector.broadcast %19 : vector<2x8x1xf32> to vector<2x8x32xf32>
    %21 = arith.mulf %20, %1 : vector<2x8x32xf32>
    %cst_14 = arith.constant dense<0.000000e+00> : vector<2x32xf32>
    %22 = vector.multi_reduction <add>, %21, %cst_14 [1] : vector<2x8x32xf32> to vector<2x32xf32>
    %cst_15 = arith.constant dense<0.000000e+00> : vector<2xf32>
    %23 = vector.multi_reduction <add>, %18, %cst_15 [1] : vector<2x8xf32> to vector<2xf32>
    %24 = vector.shape_cast %23 : vector<2xf32> to vector<2x1xf32>
    %cst_16 = arith.constant 1.000000e+00 : f32
    %25 = vector.broadcast %cst_16 : f32 to vector<2x1xf32>
    %26 = arith.divf %25, %24 : vector<2x1xf32>
    %27 = vector.broadcast %26 : vector<2x1xf32> to vector<2x32xf32>
    %28 = arith.mulf %22, %27 : vector<2x32xf32>
    %cst_17 = arith.constant 0.000000e+00 : f32
    %29 = vector.broadcast %cst_17 : f32 to vector<2x32xf32>
    %cst_18 = arith.constant 0.000000e+00 : f32
    %30 = vector.broadcast %cst_18 : f32 to vector<2x32xf32>
    %cst_19 = arith.constant 0.000000e+00 : f32
    %31 = vector.broadcast %cst_19 : f32 to vector<2x32xf32>
    %cst_20 = arith.constant 0.000000e+00 : f32
    %32 = vector.broadcast %cst_20 : f32 to vector<2x32xf32>
    %c0_21 = arith.constant 0 : index
    %33 = memref.load %arg0[%c0_21] : memref<5xf32, #tpu.memory_space<smem>>
    %cst_22 = arith.constant dense<0.000000e+00> : vector<2x128xf32>
    %34 = tpu.matmul %28, %4, %cst_22 {dimension_numbers = #tpu.dot_dimension_numbers<[1], [0], [0], [1], [0, 0, 1, 1], [], []>} : vector<2x32xf32>, vector<32x128xf32>, vector<2x128xf32> -> vector<2x128xf32>
    %35 = vector.broadcast %5 : vector<1x128xf32> to vector<2x128xf32>
    %36 = arith.addf %34, %35 : vector<2x128xf32>
    %37 = vector.extract_strided_slice %36 {offsets = [0, 96], sizes = [2, 32], strides = [1, 1]} : vector<2x128xf32> to vector<2x32xf32>
    %38 = vector.shape_cast %37 : vector<2x32xf32> to vector<2x1x32xf32>
    %39 = vector.broadcast %38 : vector<2x1x32xf32> to vector<2x10x32xf32>
    %40 = arith.mulf %39, %0 : vector<2x10x32xf32>
    %cst_23 = arith.constant dense<0.000000e+00> : vector<2x10xf32>
    %41 = vector.multi_reduction <add>, %40, %cst_23 [2] : vector<2x10x32xf32> to vector<2x10xf32>
    %cst_24 = arith.constant dense<0xFF800000> : vector<2xf32>
    %42 = vector.multi_reduction <maximumf>, %41, %cst_24 [1] : vector<2x10xf32> to vector<2xf32>
    %43 = vector.shape_cast %42 : vector<2xf32> to vector<2x1xf32>
    %44 = vector.broadcast %43 : vector<2x1xf32> to vector<2x10xf32>
    %45 = arith.subf %41, %44 : vector<2x10xf32>
    %46 = math.exp %45 : vector<2x10xf32>
    %47 = vector.shape_cast %46 : vector<2x10xf32> to vector<2x10x1xf32>
    %48 = vector.broadcast %47 : vector<2x10x1xf32> to vector<2x10x32xf32>
    %49 = arith.mulf %48, %0 : vector<2x10x32xf32>
    %cst_25 = arith.constant dense<0.000000e+00> : vector<2x32xf32>
    %50 = vector.multi_reduction <add>, %49, %cst_25 [1] : vector<2x10x32xf32> to vector<2x32xf32>
    %cst_26 = arith.constant dense<0.000000e+00> : vector<2xf32>
    %51 = vector.multi_reduction <add>, %46, %cst_26 [1] : vector<2x10xf32> to vector<2xf32>
    %52 = vector.shape_cast %51 : vector<2xf32> to vector<2x1xf32>
    %cst_27 = arith.constant 1.000000e+00 : f32
    %53 = vector.broadcast %cst_27 : f32 to vector<2x1xf32>
    %54 = arith.divf %53, %52 : vector<2x1xf32>
    %55 = vector.broadcast %54 : vector<2x1xf32> to vector<2x32xf32>
    %56 = arith.mulf %50, %55 : vector<2x32xf32>
    %cst_28 = arith.constant dense<0.000000e+00> : vector<2x128xf32>
    %57 = tpu.matmul %56, %6, %cst_28 {dimension_numbers = #tpu.dot_dimension_numbers<[1], [0], [0], [1], [0, 0, 1, 1], [], []>} : vector<2x32xf32>, vector<32x128xf32>, vector<2x128xf32> -> vector<2x128xf32>
    %58 = vector.broadcast %7 : vector<1x128xf32> to vector<2x128xf32>
    %59 = arith.addf %57, %58 : vector<2x128xf32>
    %60 = vector.extract_strided_slice %59 {offsets = [0, 0], sizes = [2, 32], strides = [1, 1]} : vector<2x128xf32> to vector<2x32xf32>
    %61 = vector.extract_strided_slice %36 {offsets = [0, 0], sizes = [2, 32], strides = [1, 1]} : vector<2x128xf32> to vector<2x32xf32>
    %62 = arith.addf %60, %61 : vector<2x32xf32>
    %63 = arith.negf %62 : vector<2x32xf32>
    %64 = math.exp %63 : vector<2x32xf32>
    %cst_29 = arith.constant 1.000000e+00 : f32
    %65 = vector.broadcast %cst_29 : f32 to vector<2x32xf32>
    %66 = arith.addf %65, %64 : vector<2x32xf32>
    %67 = arith.divf %65, %66 : vector<2x32xf32>
    %68 = vector.extract_strided_slice %59 {offsets = [0, 32], sizes = [2, 32], strides = [1, 1]} : vector<2x128xf32> to vector<2x32xf32>
    %69 = vector.extract_strided_slice %36 {offsets = [0, 32], sizes = [2, 32], strides = [1, 1]} : vector<2x128xf32> to vector<2x32xf32>
    %70 = arith.addf %68, %69 : vector<2x32xf32>
    %71 = arith.negf %70 : vector<2x32xf32>
    %72 = math.exp %71 : vector<2x32xf32>
    %cst_30 = arith.constant 1.000000e+00 : f32
    %73 = vector.broadcast %cst_30 : f32 to vector<2x32xf32>
    %74 = arith.addf %73, %72 : vector<2x32xf32>
    %75 = arith.divf %73, %74 : vector<2x32xf32>
    %76 = vector.extract_strided_slice %59 {offsets = [0, 64], sizes = [2, 32], strides = [1, 1]} : vector<2x128xf32> to vector<2x32xf32>
    %77 = vector.extract_strided_slice %36 {offsets = [0, 64], sizes = [2, 32], strides = [1, 1]} : vector<2x128xf32> to vector<2x32xf32>
    %78 = arith.mulf %67, %77 : vector<2x32xf32>
    %79 = arith.addf %76, %78 : vector<2x32xf32>
    %80 = math.tanh %79 : vector<2x32xf32>
    %cst_31 = arith.constant 1.000000e+00 : f32
    %81 = vector.broadcast %cst_31 : f32 to vector<2x32xf32>
    %82 = arith.subf %81, %75 : vector<2x32xf32>
    %83 = arith.mulf %82, %80 : vector<2x32xf32>
    %84 = arith.mulf %75, %28 : vector<2x32xf32>
    %85 = arith.addf %83, %84 : vector<2x32xf32>
    %86 = vector.broadcast %33 : f32 to vector<2x32xf32>
    %87 = arith.mulf %86, %85 : vector<2x32xf32>
    %88 = arith.addf %29, %87 : vector<2x32xf32>
    %89 = vector.broadcast %33 : f32 to vector<2x32xf32>
    %90 = arith.mulf %89, %56 : vector<2x32xf32>
    %91 = arith.addf %30, %90 : vector<2x32xf32>
    %92 = arith.subf %85, %56 : vector<2x32xf32>
    %93 = math.absf %92 : vector<2x32xf32>
    %94 = vector.broadcast %33 : f32 to vector<2x32xf32>
    %95 = arith.mulf %94, %93 : vector<2x32xf32>
    %96 = arith.addf %31, %95 : vector<2x32xf32>
    %97 = arith.mulf %85, %56 : vector<2x32xf32>
    %98 = vector.broadcast %33 : f32 to vector<2x32xf32>
    %99 = arith.mulf %98, %97 : vector<2x32xf32>
    %100 = arith.addf %32, %99 : vector<2x32xf32>
    %c1 = arith.constant 1 : index
    %101 = memref.load %arg0[%c1] : memref<5xf32, #tpu.memory_space<smem>>
    %cst_32 = arith.constant dense<0.000000e+00> : vector<2x128xf32>
    %102 = tpu.matmul %85, %4, %cst_32 {dimension_numbers = #tpu.dot_dimension_numbers<[1], [0], [0], [1], [0, 0, 1, 1], [], []>} : vector<2x32xf32>, vector<32x128xf32>, vector<2x128xf32> -> vector<2x128xf32>
    %103 = vector.broadcast %5 : vector<1x128xf32> to vector<2x128xf32>
    %104 = arith.addf %102, %103 : vector<2x128xf32>
    %105 = vector.extract_strided_slice %104 {offsets = [0, 96], sizes = [2, 32], strides = [1, 1]} : vector<2x128xf32> to vector<2x32xf32>
    %106 = vector.shape_cast %105 : vector<2x32xf32> to vector<2x1x32xf32>
    %107 = vector.broadcast %106 : vector<2x1x32xf32> to vector<2x10x32xf32>
    %108 = arith.mulf %107, %0 : vector<2x10x32xf32>
    %cst_33 = arith.constant dense<0.000000e+00> : vector<2x10xf32>
    %109 = vector.multi_reduction <add>, %108, %cst_33 [2] : vector<2x10x32xf32> to vector<2x10xf32>
    %cst_34 = arith.constant dense<0xFF800000> : vector<2xf32>
    %110 = vector.multi_reduction <maximumf>, %109, %cst_34 [1] : vector<2x10xf32> to vector<2xf32>
    %111 = vector.shape_cast %110 : vector<2xf32> to vector<2x1xf32>
    %112 = vector.broadcast %111 : vector<2x1xf32> to vector<2x10xf32>
    %113 = arith.subf %109, %112 : vector<2x10xf32>
    %114 = math.exp %113 : vector<2x10xf32>
    %115 = vector.shape_cast %114 : vector<2x10xf32> to vector<2x10x1xf32>
    %116 = vector.broadcast %115 : vector<2x10x1xf32> to vector<2x10x32xf32>
    %117 = arith.mulf %116, %0 : vector<2x10x32xf32>
    %cst_35 = arith.constant dense<0.000000e+00> : vector<2x32xf32>
    %118 = vector.multi_reduction <add>, %117, %cst_35 [1] : vector<2x10x32xf32> to vector<2x32xf32>
    %cst_36 = arith.constant dense<0.000000e+00> : vector<2xf32>
    %119 = vector.multi_reduction <add>, %114, %cst_36 [1] : vector<2x10xf32> to vector<2xf32>
    %120 = vector.shape_cast %119 : vector<2xf32> to vector<2x1xf32>
    %cst_37 = arith.constant 1.000000e+00 : f32
    %121 = vector.broadcast %cst_37 : f32 to vector<2x1xf32>
    %122 = arith.divf %121, %120 : vector<2x1xf32>
    %123 = vector.broadcast %122 : vector<2x1xf32> to vector<2x32xf32>
    %124 = arith.mulf %118, %123 : vector<2x32xf32>
    %cst_38 = arith.constant dense<0.000000e+00> : vector<2x128xf32>
    %125 = tpu.matmul %124, %6, %cst_38 {dimension_numbers = #tpu.dot_dimension_numbers<[1], [0], [0], [1], [0, 0, 1, 1], [], []>} : vector<2x32xf32>, vector<32x128xf32>, vector<2x128xf32> -> vector<2x128xf32>
    %126 = vector.broadcast %7 : vector<1x128xf32> to vector<2x128xf32>
    %127 = arith.addf %125, %126 : vector<2x128xf32>
    %128 = vector.extract_strided_slice %127 {offsets = [0, 0], sizes = [2, 32], strides = [1, 1]} : vector<2x128xf32> to vector<2x32xf32>
    %129 = vector.extract_strided_slice %104 {offsets = [0, 0], sizes = [2, 32], strides = [1, 1]} : vector<2x128xf32> to vector<2x32xf32>
    %130 = arith.addf %128, %129 : vector<2x32xf32>
    %131 = arith.negf %130 : vector<2x32xf32>
    %132 = math.exp %131 : vector<2x32xf32>
    %cst_39 = arith.constant 1.000000e+00 : f32
    %133 = vector.broadcast %cst_39 : f32 to vector<2x32xf32>
    %134 = arith.addf %133, %132 : vector<2x32xf32>
    %135 = arith.divf %133, %134 : vector<2x32xf32>
    %136 = vector.extract_strided_slice %127 {offsets = [0, 32], sizes = [2, 32], strides = [1, 1]} : vector<2x128xf32> to vector<2x32xf32>
    %137 = vector.extract_strided_slice %104 {offsets = [0, 32], sizes = [2, 32], strides = [1, 1]} : vector<2x128xf32> to vector<2x32xf32>
    %138 = arith.addf %136, %137 : vector<2x32xf32>
    %139 = arith.negf %138 : vector<2x32xf32>
    %140 = math.exp %139 : vector<2x32xf32>
    %cst_40 = arith.constant 1.000000e+00 : f32
    %141 = vector.broadcast %cst_40 : f32 to vector<2x32xf32>
    %142 = arith.addf %141, %140 : vector<2x32xf32>
    %143 = arith.divf %141, %142 : vector<2x32xf32>
    %144 = vector.extract_strided_slice %127 {offsets = [0, 64], sizes = [2, 32], strides = [1, 1]} : vector<2x128xf32> to vector<2x32xf32>
    %145 = vector.extract_strided_slice %104 {offsets = [0, 64], sizes = [2, 32], strides = [1, 1]} : vector<2x128xf32> to vector<2x32xf32>
    %146 = arith.mulf %135, %145 : vector<2x32xf32>
    %147 = arith.addf %144, %146 : vector<2x32xf32>
    %148 = math.tanh %147 : vector<2x32xf32>
    %cst_41 = arith.constant 1.000000e+00 : f32
    %149 = vector.broadcast %cst_41 : f32 to vector<2x32xf32>
    %150 = arith.subf %149, %143 : vector<2x32xf32>
    %151 = arith.mulf %150, %148 : vector<2x32xf32>
    %152 = arith.mulf %143, %85 : vector<2x32xf32>
    %153 = arith.addf %151, %152 : vector<2x32xf32>
    %154 = vector.broadcast %101 : f32 to vector<2x32xf32>
    %155 = arith.mulf %154, %153 : vector<2x32xf32>
    %156 = arith.addf %88, %155 : vector<2x32xf32>
    %157 = vector.broadcast %101 : f32 to vector<2x32xf32>
    %158 = arith.mulf %157, %124 : vector<2x32xf32>
    %159 = arith.addf %91, %158 : vector<2x32xf32>
    %160 = arith.subf %153, %124 : vector<2x32xf32>
    %161 = math.absf %160 : vector<2x32xf32>
    %162 = vector.broadcast %101 : f32 to vector<2x32xf32>
    %163 = arith.mulf %162, %161 : vector<2x32xf32>
    %164 = arith.addf %96, %163 : vector<2x32xf32>
    %165 = arith.mulf %153, %124 : vector<2x32xf32>
    %166 = vector.broadcast %101 : f32 to vector<2x32xf32>
    %167 = arith.mulf %166, %165 : vector<2x32xf32>
    %168 = arith.addf %100, %167 : vector<2x32xf32>
    %c2 = arith.constant 2 : index
    %169 = memref.load %arg0[%c2] : memref<5xf32, #tpu.memory_space<smem>>
    %cst_42 = arith.constant dense<0.000000e+00> : vector<2x128xf32>
    %170 = tpu.matmul %153, %4, %cst_42 {dimension_numbers = #tpu.dot_dimension_numbers<[1], [0], [0], [1], [0, 0, 1, 1], [], []>} : vector<2x32xf32>, vector<32x128xf32>, vector<2x128xf32> -> vector<2x128xf32>
    %171 = vector.broadcast %5 : vector<1x128xf32> to vector<2x128xf32>
    %172 = arith.addf %170, %171 : vector<2x128xf32>
    %173 = vector.extract_strided_slice %172 {offsets = [0, 96], sizes = [2, 32], strides = [1, 1]} : vector<2x128xf32> to vector<2x32xf32>
    %174 = vector.shape_cast %173 : vector<2x32xf32> to vector<2x1x32xf32>
    %175 = vector.broadcast %174 : vector<2x1x32xf32> to vector<2x10x32xf32>
    %176 = arith.mulf %175, %0 : vector<2x10x32xf32>
    %cst_43 = arith.constant dense<0.000000e+00> : vector<2x10xf32>
    %177 = vector.multi_reduction <add>, %176, %cst_43 [2] : vector<2x10x32xf32> to vector<2x10xf32>
    %cst_44 = arith.constant dense<0xFF800000> : vector<2xf32>
    %178 = vector.multi_reduction <maximumf>, %177, %cst_44 [1] : vector<2x10xf32> to vector<2xf32>
    %179 = vector.shape_cast %178 : vector<2xf32> to vector<2x1xf32>
    %180 = vector.broadcast %179 : vector<2x1xf32> to vector<2x10xf32>
    %181 = arith.subf %177, %180 : vector<2x10xf32>
    %182 = math.exp %181 : vector<2x10xf32>
    %183 = vector.shape_cast %182 : vector<2x10xf32> to vector<2x10x1xf32>
    %184 = vector.broadcast %183 : vector<2x10x1xf32> to vector<2x10x32xf32>
    %185 = arith.mulf %184, %0 : vector<2x10x32xf32>
    %cst_45 = arith.constant dense<0.000000e+00> : vector<2x32xf32>
    %186 = vector.multi_reduction <add>, %185, %cst_45 [1] : vector<2x10x32xf32> to vector<2x32xf32>
    %cst_46 = arith.constant dense<0.000000e+00> : vector<2xf32>
    %187 = vector.multi_reduction <add>, %182, %cst_46 [1] : vector<2x10xf32> to vector<2xf32>
    %188 = vector.shape_cast %187 : vector<2xf32> to vector<2x1xf32>
    %cst_47 = arith.constant 1.000000e+00 : f32
    %189 = vector.broadcast %cst_47 : f32 to vector<2x1xf32>
    %190 = arith.divf %189, %188 : vector<2x1xf32>
    %191 = vector.broadcast %190 : vector<2x1xf32> to vector<2x32xf32>
    %192 = arith.mulf %186, %191 : vector<2x32xf32>
    %cst_48 = arith.constant dense<0.000000e+00> : vector<2x128xf32>
    %193 = tpu.matmul %192, %6, %cst_48 {dimension_numbers = #tpu.dot_dimension_numbers<[1], [0], [0], [1], [0, 0, 1, 1], [], []>} : vector<2x32xf32>, vector<32x128xf32>, vector<2x128xf32> -> vector<2x128xf32>
    %194 = vector.broadcast %7 : vector<1x128xf32> to vector<2x128xf32>
    %195 = arith.addf %193, %194 : vector<2x128xf32>
    %196 = vector.extract_strided_slice %195 {offsets = [0, 0], sizes = [2, 32], strides = [1, 1]} : vector<2x128xf32> to vector<2x32xf32>
    %197 = vector.extract_strided_slice %172 {offsets = [0, 0], sizes = [2, 32], strides = [1, 1]} : vector<2x128xf32> to vector<2x32xf32>
    %198 = arith.addf %196, %197 : vector<2x32xf32>
    %199 = arith.negf %198 : vector<2x32xf32>
    %200 = math.exp %199 : vector<2x32xf32>
    %cst_49 = arith.constant 1.000000e+00 : f32
    %201 = vector.broadcast %cst_49 : f32 to vector<2x32xf32>
    %202 = arith.addf %201, %200 : vector<2x32xf32>
    %203 = arith.divf %201, %202 : vector<2x32xf32>
    %204 = vector.extract_strided_slice %195 {offsets = [0, 32], sizes = [2, 32], strides = [1, 1]} : vector<2x128xf32> to vector<2x32xf32>
    %205 = vector.extract_strided_slice %172 {offsets = [0, 32], sizes = [2, 32], strides = [1, 1]} : vector<2x128xf32> to vector<2x32xf32>
    %206 = arith.addf %204, %205 : vector<2x32xf32>
    %207 = arith.negf %206 : vector<2x32xf32>
    %208 = math.exp %207 : vector<2x32xf32>
    %cst_50 = arith.constant 1.000000e+00 : f32
    %209 = vector.broadcast %cst_50 : f32 to vector<2x32xf32>
    %210 = arith.addf %209, %208 : vector<2x32xf32>
    %211 = arith.divf %209, %210 : vector<2x32xf32>
    %212 = vector.extract_strided_slice %195 {offsets = [0, 64], sizes = [2, 32], strides = [1, 1]} : vector<2x128xf32> to vector<2x32xf32>
    %213 = vector.extract_strided_slice %172 {offsets = [0, 64], sizes = [2, 32], strides = [1, 1]} : vector<2x128xf32> to vector<2x32xf32>
    %214 = arith.mulf %203, %213 : vector<2x32xf32>
    %215 = arith.addf %212, %214 : vector<2x32xf32>
    %216 = math.tanh %215 : vector<2x32xf32>
    %cst_51 = arith.constant 1.000000e+00 : f32
    %217 = vector.broadcast %cst_51 : f32 to vector<2x32xf32>
    %218 = arith.subf %217, %211 : vector<2x32xf32>
    %219 = arith.mulf %218, %216 : vector<2x32xf32>
    %220 = arith.mulf %211, %153 : vector<2x32xf32>
    %221 = arith.addf %219, %220 : vector<2x32xf32>
    %222 = vector.broadcast %169 : f32 to vector<2x32xf32>
    %223 = arith.mulf %222, %221 : vector<2x32xf32>
    %224 = arith.addf %156, %223 : vector<2x32xf32>
    %225 = vector.broadcast %169 : f32 to vector<2x32xf32>
    %226 = arith.mulf %225, %192 : vector<2x32xf32>
    %227 = arith.addf %159, %226 : vector<2x32xf32>
    %228 = arith.subf %221, %192 : vector<2x32xf32>
    %229 = math.absf %228 : vector<2x32xf32>
    %230 = vector.broadcast %169 : f32 to vector<2x32xf32>
    %231 = arith.mulf %230, %229 : vector<2x32xf32>
    %232 = arith.addf %164, %231 : vector<2x32xf32>
    %233 = arith.mulf %221, %192 : vector<2x32xf32>
    %234 = vector.broadcast %169 : f32 to vector<2x32xf32>
    %235 = arith.mulf %234, %233 : vector<2x32xf32>
    %236 = arith.addf %168, %235 : vector<2x32xf32>
    %c3 = arith.constant 3 : index
    %237 = memref.load %arg0[%c3] : memref<5xf32, #tpu.memory_space<smem>>
    %cst_52 = arith.constant dense<0.000000e+00> : vector<2x128xf32>
    %238 = tpu.matmul %221, %4, %cst_52 {dimension_numbers = #tpu.dot_dimension_numbers<[1], [0], [0], [1], [0, 0, 1, 1], [], []>} : vector<2x32xf32>, vector<32x128xf32>, vector<2x128xf32> -> vector<2x128xf32>
    %239 = vector.broadcast %5 : vector<1x128xf32> to vector<2x128xf32>
    %240 = arith.addf %238, %239 : vector<2x128xf32>
    %241 = vector.extract_strided_slice %240 {offsets = [0, 96], sizes = [2, 32], strides = [1, 1]} : vector<2x128xf32> to vector<2x32xf32>
    %242 = vector.shape_cast %241 : vector<2x32xf32> to vector<2x1x32xf32>
    %243 = vector.broadcast %242 : vector<2x1x32xf32> to vector<2x10x32xf32>
    %244 = arith.mulf %243, %0 : vector<2x10x32xf32>
    %cst_53 = arith.constant dense<0.000000e+00> : vector<2x10xf32>
    %245 = vector.multi_reduction <add>, %244, %cst_53 [2] : vector<2x10x32xf32> to vector<2x10xf32>
    %cst_54 = arith.constant dense<0xFF800000> : vector<2xf32>
    %246 = vector.multi_reduction <maximumf>, %245, %cst_54 [1] : vector<2x10xf32> to vector<2xf32>
    %247 = vector.shape_cast %246 : vector<2xf32> to vector<2x1xf32>
    %248 = vector.broadcast %247 : vector<2x1xf32> to vector<2x10xf32>
    %249 = arith.subf %245, %248 : vector<2x10xf32>
    %250 = math.exp %249 : vector<2x10xf32>
    %251 = vector.shape_cast %250 : vector<2x10xf32> to vector<2x10x1xf32>
    %252 = vector.broadcast %251 : vector<2x10x1xf32> to vector<2x10x32xf32>
    %253 = arith.mulf %252, %0 : vector<2x10x32xf32>
    %cst_55 = arith.constant dense<0.000000e+00> : vector<2x32xf32>
    %254 = vector.multi_reduction <add>, %253, %cst_55 [1] : vector<2x10x32xf32> to vector<2x32xf32>
    %cst_56 = arith.constant dense<0.000000e+00> : vector<2xf32>
    %255 = vector.multi_reduction <add>, %250, %cst_56 [1] : vector<2x10xf32> to vector<2xf32>
    %256 = vector.shape_cast %255 : vector<2xf32> to vector<2x1xf32>
    %cst_57 = arith.constant 1.000000e+00 : f32
    %257 = vector.broadcast %cst_57 : f32 to vector<2x1xf32>
    %258 = arith.divf %257, %256 : vector<2x1xf32>
    %259 = vector.broadcast %258 : vector<2x1xf32> to vector<2x32xf32>
    %260 = arith.mulf %254, %259 : vector<2x32xf32>
    %cst_58 = arith.constant dense<0.000000e+00> : vector<2x128xf32>
    %261 = tpu.matmul %260, %6, %cst_58 {dimension_numbers = #tpu.dot_dimension_numbers<[1], [0], [0], [1], [0, 0, 1, 1], [], []>} : vector<2x32xf32>, vector<32x128xf32>, vector<2x128xf32> -> vector<2x128xf32>
    %262 = vector.broadcast %7 : vector<1x128xf32> to vector<2x128xf32>
    %263 = arith.addf %261, %262 : vector<2x128xf32>
    %264 = vector.extract_strided_slice %263 {offsets = [0, 0], sizes = [2, 32], strides = [1, 1]} : vector<2x128xf32> to vector<2x32xf32>
    %265 = vector.extract_strided_slice %240 {offsets = [0, 0], sizes = [2, 32], strides = [1, 1]} : vector<2x128xf32> to vector<2x32xf32>
    %266 = arith.addf %264, %265 : vector<2x32xf32>
    %267 = arith.negf %266 : vector<2x32xf32>
    %268 = math.exp %267 : vector<2x32xf32>
    %cst_59 = arith.constant 1.000000e+00 : f32
    %269 = vector.broadcast %cst_59 : f32 to vector<2x32xf32>
    %270 = arith.addf %269, %268 : vector<2x32xf32>
    %271 = arith.divf %269, %270 : vector<2x32xf32>
    %272 = vector.extract_strided_slice %263 {offsets = [0, 32], sizes = [2, 32], strides = [1, 1]} : vector<2x128xf32> to vector<2x32xf32>
    %273 = vector.extract_strided_slice %240 {offsets = [0, 32], sizes = [2, 32], strides = [1, 1]} : vector<2x128xf32> to vector<2x32xf32>
    %274 = arith.addf %272, %273 : vector<2x32xf32>
    %275 = arith.negf %274 : vector<2x32xf32>
    %276 = math.exp %275 : vector<2x32xf32>
    %cst_60 = arith.constant 1.000000e+00 : f32
    %277 = vector.broadcast %cst_60 : f32 to vector<2x32xf32>
    %278 = arith.addf %277, %276 : vector<2x32xf32>
    %279 = arith.divf %277, %278 : vector<2x32xf32>
    %280 = vector.extract_strided_slice %263 {offsets = [0, 64], sizes = [2, 32], strides = [1, 1]} : vector<2x128xf32> to vector<2x32xf32>
    %281 = vector.extract_strided_slice %240 {offsets = [0, 64], sizes = [2, 32], strides = [1, 1]} : vector<2x128xf32> to vector<2x32xf32>
    %282 = arith.mulf %271, %281 : vector<2x32xf32>
    %283 = arith.addf %280, %282 : vector<2x32xf32>
    %284 = math.tanh %283 : vector<2x32xf32>
    %cst_61 = arith.constant 1.000000e+00 : f32
    %285 = vector.broadcast %cst_61 : f32 to vector<2x32xf32>
    %286 = arith.subf %285, %279 : vector<2x32xf32>
    %287 = arith.mulf %286, %284 : vector<2x32xf32>
    %288 = arith.mulf %279, %221 : vector<2x32xf32>
    %289 = arith.addf %287, %288 : vector<2x32xf32>
    %290 = vector.broadcast %237 : f32 to vector<2x32xf32>
    %291 = arith.mulf %290, %289 : vector<2x32xf32>
    %292 = arith.addf %224, %291 : vector<2x32xf32>
    %293 = vector.broadcast %237 : f32 to vector<2x32xf32>
    %294 = arith.mulf %293, %260 : vector<2x32xf32>
    %295 = arith.addf %227, %294 : vector<2x32xf32>
    %296 = arith.subf %289, %260 : vector<2x32xf32>
    %297 = math.absf %296 : vector<2x32xf32>
    %298 = vector.broadcast %237 : f32 to vector<2x32xf32>
    %299 = arith.mulf %298, %297 : vector<2x32xf32>
    %300 = arith.addf %232, %299 : vector<2x32xf32>
    %301 = arith.mulf %289, %260 : vector<2x32xf32>
    %302 = vector.broadcast %237 : f32 to vector<2x32xf32>
    %303 = arith.mulf %302, %301 : vector<2x32xf32>
    %304 = arith.addf %236, %303 : vector<2x32xf32>
    %c4 = arith.constant 4 : index
    %305 = memref.load %arg0[%c4] : memref<5xf32, #tpu.memory_space<smem>>
    %cst_62 = arith.constant dense<0.000000e+00> : vector<2x128xf32>
    %306 = tpu.matmul %289, %4, %cst_62 {dimension_numbers = #tpu.dot_dimension_numbers<[1], [0], [0], [1], [0, 0, 1, 1], [], []>} : vector<2x32xf32>, vector<32x128xf32>, vector<2x128xf32> -> vector<2x128xf32>
    %307 = vector.broadcast %5 : vector<1x128xf32> to vector<2x128xf32>
    %308 = arith.addf %306, %307 : vector<2x128xf32>
    %309 = vector.extract_strided_slice %308 {offsets = [0, 96], sizes = [2, 32], strides = [1, 1]} : vector<2x128xf32> to vector<2x32xf32>
    %310 = vector.shape_cast %309 : vector<2x32xf32> to vector<2x1x32xf32>
    %311 = vector.broadcast %310 : vector<2x1x32xf32> to vector<2x10x32xf32>
    %312 = arith.mulf %311, %0 : vector<2x10x32xf32>
    %cst_63 = arith.constant dense<0.000000e+00> : vector<2x10xf32>
    %313 = vector.multi_reduction <add>, %312, %cst_63 [2] : vector<2x10x32xf32> to vector<2x10xf32>
    %cst_64 = arith.constant dense<0xFF800000> : vector<2xf32>
    %314 = vector.multi_reduction <maximumf>, %313, %cst_64 [1] : vector<2x10xf32> to vector<2xf32>
    %315 = vector.shape_cast %314 : vector<2xf32> to vector<2x1xf32>
    %316 = vector.broadcast %315 : vector<2x1xf32> to vector<2x10xf32>
    %317 = arith.subf %313, %316 : vector<2x10xf32>
    %318 = math.exp %317 : vector<2x10xf32>
    %319 = vector.shape_cast %318 : vector<2x10xf32> to vector<2x10x1xf32>
    %320 = vector.broadcast %319 : vector<2x10x1xf32> to vector<2x10x32xf32>
    %321 = arith.mulf %320, %0 : vector<2x10x32xf32>
    %cst_65 = arith.constant dense<0.000000e+00> : vector<2x32xf32>
    %322 = vector.multi_reduction <add>, %321, %cst_65 [1] : vector<2x10x32xf32> to vector<2x32xf32>
    %cst_66 = arith.constant dense<0.000000e+00> : vector<2xf32>
    %323 = vector.multi_reduction <add>, %318, %cst_66 [1] : vector<2x10xf32> to vector<2xf32>
    %324 = vector.shape_cast %323 : vector<2xf32> to vector<2x1xf32>
    %cst_67 = arith.constant 1.000000e+00 : f32
    %325 = vector.broadcast %cst_67 : f32 to vector<2x1xf32>
    %326 = arith.divf %325, %324 : vector<2x1xf32>
    %327 = vector.broadcast %326 : vector<2x1xf32> to vector<2x32xf32>
    %328 = arith.mulf %322, %327 : vector<2x32xf32>
    %cst_68 = arith.constant dense<0.000000e+00> : vector<2x128xf32>
    %329 = tpu.matmul %328, %6, %cst_68 {dimension_numbers = #tpu.dot_dimension_numbers<[1], [0], [0], [1], [0, 0, 1, 1], [], []>} : vector<2x32xf32>, vector<32x128xf32>, vector<2x128xf32> -> vector<2x128xf32>
    %330 = vector.broadcast %7 : vector<1x128xf32> to vector<2x128xf32>
    %331 = arith.addf %329, %330 : vector<2x128xf32>
    %332 = vector.extract_strided_slice %331 {offsets = [0, 0], sizes = [2, 32], strides = [1, 1]} : vector<2x128xf32> to vector<2x32xf32>
    %333 = vector.extract_strided_slice %308 {offsets = [0, 0], sizes = [2, 32], strides = [1, 1]} : vector<2x128xf32> to vector<2x32xf32>
    %334 = arith.addf %332, %333 : vector<2x32xf32>
    %335 = arith.negf %334 : vector<2x32xf32>
    %336 = math.exp %335 : vector<2x32xf32>
    %cst_69 = arith.constant 1.000000e+00 : f32
    %337 = vector.broadcast %cst_69 : f32 to vector<2x32xf32>
    %338 = arith.addf %337, %336 : vector<2x32xf32>
    %339 = arith.divf %337, %338 : vector<2x32xf32>
    %340 = vector.extract_strided_slice %331 {offsets = [0, 32], sizes = [2, 32], strides = [1, 1]} : vector<2x128xf32> to vector<2x32xf32>
    %341 = vector.extract_strided_slice %308 {offsets = [0, 32], sizes = [2, 32], strides = [1, 1]} : vector<2x128xf32> to vector<2x32xf32>
    %342 = arith.addf %340, %341 : vector<2x32xf32>
    %343 = arith.negf %342 : vector<2x32xf32>
    %344 = math.exp %343 : vector<2x32xf32>
    %cst_70 = arith.constant 1.000000e+00 : f32
    %345 = vector.broadcast %cst_70 : f32 to vector<2x32xf32>
    %346 = arith.addf %345, %344 : vector<2x32xf32>
    %347 = arith.divf %345, %346 : vector<2x32xf32>
    %348 = vector.extract_strided_slice %331 {offsets = [0, 64], sizes = [2, 32], strides = [1, 1]} : vector<2x128xf32> to vector<2x32xf32>
    %349 = vector.extract_strided_slice %308 {offsets = [0, 64], sizes = [2, 32], strides = [1, 1]} : vector<2x128xf32> to vector<2x32xf32>
    %350 = arith.mulf %339, %349 : vector<2x32xf32>
    %351 = arith.addf %348, %350 : vector<2x32xf32>
    %352 = math.tanh %351 : vector<2x32xf32>
    %cst_71 = arith.constant 1.000000e+00 : f32
    %353 = vector.broadcast %cst_71 : f32 to vector<2x32xf32>
    %354 = arith.subf %353, %347 : vector<2x32xf32>
    %355 = arith.mulf %354, %352 : vector<2x32xf32>
    %356 = arith.mulf %347, %289 : vector<2x32xf32>
    %357 = arith.addf %355, %356 : vector<2x32xf32>
    %358 = vector.broadcast %305 : f32 to vector<2x32xf32>
    %359 = arith.mulf %358, %357 : vector<2x32xf32>
    %360 = arith.addf %292, %359 : vector<2x32xf32>
    %361 = vector.broadcast %305 : f32 to vector<2x32xf32>
    %362 = arith.mulf %361, %328 : vector<2x32xf32>
    %363 = arith.addf %295, %362 : vector<2x32xf32>
    %364 = arith.subf %357, %328 : vector<2x32xf32>
    %365 = math.absf %364 : vector<2x32xf32>
    %366 = vector.broadcast %305 : f32 to vector<2x32xf32>
    %367 = arith.mulf %366, %365 : vector<2x32xf32>
    %368 = arith.addf %300, %367 : vector<2x32xf32>
    %369 = arith.mulf %357, %328 : vector<2x32xf32>
    %370 = vector.broadcast %305 : f32 to vector<2x32xf32>
    %371 = arith.mulf %370, %369 : vector<2x32xf32>
    %372 = arith.addf %304, %371 : vector<2x32xf32>
    %c0_72 = arith.constant 0 : index
    %373 = memref.load %arg0[%c0_72] : memref<5xf32, #tpu.memory_space<smem>>
    %c1_73 = arith.constant 1 : index
    %374 = memref.load %arg0[%c1_73] : memref<5xf32, #tpu.memory_space<smem>>
    %375 = arith.addf %373, %374 : f32
    %c2_74 = arith.constant 2 : index
    %376 = memref.load %arg0[%c2_74] : memref<5xf32, #tpu.memory_space<smem>>
    %377 = arith.addf %375, %376 : f32
    %c3_75 = arith.constant 3 : index
    %378 = memref.load %arg0[%c3_75] : memref<5xf32, #tpu.memory_space<smem>>
    %379 = arith.addf %377, %378 : f32
    %c4_76 = arith.constant 4 : index
    %380 = memref.load %arg0[%c4_76] : memref<5xf32, #tpu.memory_space<smem>>
    %381 = arith.addf %379, %380 : f32
    %382 = tpu.concatenate %360, %363, %368, %372 in 1 : vector<2x32xf32>, vector<2x32xf32>, vector<2x32xf32>, vector<2x32xf32> -> vector<2x128xf32>
    %cst_77 = arith.constant dense<0.000000e+00> : vector<2x128xf32>
    %383 = tpu.matmul %382, %8, %cst_77 {dimension_numbers = #tpu.dot_dimension_numbers<[1], [0], [0], [1], [0, 0, 1, 1], [], []>} : vector<2x128xf32>, vector<128x128xf32>, vector<2x128xf32> -> vector<2x128xf32>
    %384 = vector.broadcast %381 : f32 to vector<1x128xf32>
    %385 = arith.mulf %384, %9 : vector<1x128xf32>
    %386 = vector.broadcast %385 : vector<1x128xf32> to vector<2x128xf32>
    %387 = arith.addf %383, %386 : vector<2x128xf32>
    %388 = vector.extract_strided_slice %387 {offsets = [0, 0], sizes = [2, 4], strides = [1, 1]} : vector<2x128xf32> to vector<2x4xf32>
    %c0_78 = arith.constant 0 : index
    %c0_79 = arith.constant 0 : index
    %389 = vector.load %arg4[%c0_78, %c0_79] : memref<2x4xf32, #tpu.memory_space<vmem>>, vector<2x4xf32>
    tpu.vector_store %arg4[%c0_78, %c0_79], %388 {strides = array<i32>} : memref<2x4xf32, #tpu.memory_space<vmem>>, vector<2x4xf32>,
    return
  }
}

</mosaic_0001>

<bundles_post_ra>
// kernel: tpu_custom_call.1
= control target key start
LH: loop header
LB: loop body
LE: loop exit
PB: predicated region body
PF: predicated region fallthrough
CT: control target
= control target key end

     0   :  { %9 = vsyncpa [#allocation5], 0  ;;  %s2299_s0 = inlined_call_operand.vmem [shape: f32[5], index: 0, kind: input, shape index: {}]   ;;  %s2300_s1 = inlined_call_operand.vmem [shape: f32[2,10,32], index: 1, kind: input, shape index: {}]   ;;  %s2301_s2 = inlined_call_operand.vmem [shape: f32[2,8,32], index: 2, kind: input, shape index: {}]   ;;  %s2302_s3 = inlined_call_operand.hbm [shape: f32[224,128], index: 3, kind: input, shape index: {}]   ;;  %s2303_s4 = inlined_call_operand.hbm [shape: f32[2,4], index: 4, kind: output, shape index: {}]  }
   0x1   :  { %10 = vsyncpa [#allocation3], 0 }
   0x2   :  { %11 = vsyncpa [#allocation4], 0  ;;  %s17_s17 = sshll.u32 %s2299_s0, 4  ;;  %s29_s20 = sshll.u32 %s2302_s3, 4  ;;  %s18_s17 = int_to_ptr.vmem [resolvable:$true] %s17_s17  ;;  %s30_s20 = int_to_ptr.hbm [resolvable:$true] %s29_s20 }
   0x3   :  { %s1718_s21 = smov [#allocation2]   ;;  %s1719_s22 = smov [#allocation6]  }
   0x4   :  { %20 = dma.vmem_to_smem %s18_s17, 16, %s1718_s21, [#allocation5]  }
   0x5   :  { %s31_s23 = sshll.u32 %s1719_s22, 4  ;;  %s1720_s24 = smov 128   ;;  %s32_s23 = int_to_ptr.vmem [resolvable:$true] %s31_s23 }
   0x6   :  { %s1721_s25 = smov 8  }
   0x7   :  { %37 = dma.hbm_to_vmem [thread:$0]  %s30_s20, 3584, %s32_s23, [#allocation3], %s1720_s24, %s1720_s24, %s1721_s25  }
   0x8   :  { %1712 = dma.done.wait [#allocation5], 16  }
   0x9   :  { %1713 = vsyncadd [#allocation5], 4294967280 }
   0xa   :  { %1714 = dma.done.wait [#allocation3], 3584  }
   0xb   :  { %1715 = vsyncadd [#allocation3], 4294963712 }
   0xc   :  { %46 = sfence }
   0xd   :  { %v51_v0 = vld [vmem:[%s2301_s2] sm:$0xff]  ;;  %vm84_vm0 = vcmask 261120   ;;  %v52_v3 = vld [vmem:[%s2301_s2 + $0x8] sm:$0xff]  ;;  %v93_v8 = vlaneseq  ;;  %vm97_vm1 = vcmask 1041409   ;;  %vm100_vm2 = vcmask 58368   ;;  %v1778_v32 = vld [vmem:[#allocation6 + $0x18] sm:$0xff] }
   0xe   :  { %v1557_v1 = vld [vmem:[#allocation6] ss:$0 sm:$0xff]  ;;  %v1722_v15 = vmov 0   ;;  %v1782_v33 = vld [vmem:[#allocation6 + $0x10] sm:$0xff]  ;;  %v1786_v34 = vld [vmem:[#allocation6 + $0x8] sm:$0xff]  ;;  %s1723_s5 = smov 96  }
   0xf   :  { %v82_v2 = vmul.f32 %v1557_v1, %v51_v0  ;;  %v83_v5 = vmul.f32 %v1557_v1, %v52_v3  ;;  %v1766_v9 = vand.u32 127, %v93_v8  ;;  %1550 = vset.pattern.permute.xlu2 %v1722_v15  ;;  %1549 = vset.pattern.permute.xlu1 %v1722_v15  ;;  %v1776_v31 = vld [vmem:[#allocation6 + $0x20] sm:$0xff]  ;;  %v1797_v37 = vld [vmem:[%s2300_s1 + $0x8] sm:$0x3]  ;;  %v1815_v42 = vld [vmem:[%s2300_s1 + $0x18] sm:$0x3] }
  0x10   :  { %1551 = vset.pattern.permute.xlu0 %v1722_v15  ;;  %189 = vmatpush.msra.mxu0 %v1776_v31  ;;  %v1802_v38 = vld [vmem:[%s2300_s1] sm:$0xff]  ;;  %v1820_v43 = vld [vmem:[%s2300_s1 + $0x10] sm:$0xff]  ;;  %v1837_v8 = vld [vmem:[#allocation6 + $0x28] ss:$0 sm:$0xff]  ;;  %s1724_s10 = smov 32   ;;  %vm242_vm7 = vcmask 254976  }
  0x11   :  { %v85_v4 = vsel %vm84_vm0, %v82_v2, 0.0  ;;  %v88_v6 = vsel %vm84_vm0, %v83_v5, 0.0  ;;  %464 = vmatpush.msra.mxu3 %v1776_v31  ;;  %vm259_vm8 = vcmask 130112   ;;  %vm266_vm9 = vcmask 74752   ;;  %s1725_s11 = smov 64   ;;  %s1986_s12 = sld [smem:[#allocation2]] }
  0x12   :  { %86 = vadd.xlane.f32.xlu0 %v85_v4  ;;  %190 = vmatpush.msra.mxu0 %v1778_v32  ;;  %s1988_s13 = sld [smem:[#allocation2 + $0x1]]  ;;  %s1726_s3 = smov [#allocation7]  }
  0x13   :  { %465 = vmatpush.msra.mxu3 %v1778_v32  ;;  %s2068_s14 = sld [smem:[#allocation2 + $0x2]]  ;;  %s1508_s27 = sshll.u32 %s1726_s3, 4  ;;  %s1509_s27 = int_to_ptr.vmem [resolvable:$true] %s1508_s27 }
  0x14   :  { %191 = vmatpush.msra.mxu0 %v1782_v33  ;;  %s2238_s23 = sld [smem:[#allocation2 + $0x4]]  ;;  %s1510_s29 = sshll.u32 %s2303_s4, 4  ;;  %s1511_s29 = int_to_ptr.hbm [resolvable:$true] %s1510_s29 }
  0x15   :  { %466 = vmatpush.msra.mxu3 %v1782_v33 }
  0x16   :  { %192 = vmatpush.msra.mxu0 %v1786_v34 }
  0x17   :  { %467 = vmatpush.msra.mxu3 %v1786_v34 }
  0x18   :  { %715 = vmatpush.msrb.mxu0 %v1776_v31  ;;  %s1450_s24 = sadd.f32 %s1988_s13, %s1986_s12 }
  0x1a   :  { %89 = vadd.xlane.f32.xlu0 %v88_v6  ;;  %716 = vmatpush.msrb.mxu0 %v1778_v32  ;;  %s1451_s25 = sadd.f32 %s2068_s14, %s1450_s24 }
  0x1c   :  { %717 = vmatpush.msrb.mxu0 %v1782_v33 }
  0x1e   :  { %718 = vmatpush.msrb.mxu0 %v1786_v34 }
  0x2e   :  { %207 = vrot.lane.b32.xlu0 %v1802_v38, %s1723_s5 }
  0x36   :  { %211 = vrot.lane.b32.xlu0 %v1820_v43, %s1723_s5 }
  0x85   :  { %v87_v7 = vpop.xlane.xlu0 %86 }
  0x86   :  { %v95_v11 = vperm.slane %v87_v7, %v1766_v9 }
  0x8d   :  { %v90_v10 = vpop.xlane.xlu0 %89 }
  0x8e   :  { %v96_v12 = vperm.slane %v90_v10, %v1766_v9 }
  0x90   :  { %v98_v13 = vsel %vm97_vm1, %v96_v12, %v95_v11 }
  0x91   :  { %v101_v14 = vsel %vm100_vm2, %v98_v13, -inf }
  0x92   :  { %102 = vmax.xlane.f32.xlu1 %v101_v14 }
 0x105   :  { %v103_v16 = vpop.xlane.xlu1 %102 }
 0x106   :  { %v105_v17 = vperm.slane %v103_v16, 0  ;;  %v106_v18 = vperm.slane %v103_v16, 1 }
 0x108   :  { %v109_v19 = vsub.f32 %v87_v7, %v105_v17  ;;  %v110_v20 = vsub.f32 %v90_v10, %v106_v18  ;;  %v1835_v7 = vpop.permute.xlu0 %207 }
 0x10a   :  { %v111_v21 = vmul.f32 1.442695, %v109_v19  ;;  %v113_v22 = vmul.f32 1.442695, %v110_v20 }
 0x10c   :  { %1560 = vpow2.f32 %v111_v21 }
 0x10d   :  { %1562 = vpow2.f32 %v113_v22 }
 0x110   :  { %v1846_v15 = vpop.permute.xlu0 %211 }
 0x112   :  { %v1561_v23 = vpop.eup %1560 }
 0x113   :  { %v1563_v24 = vpop.eup %1562  ;;  %117 = vperm.xlu1 %1549, %v1561_v23  }
 0x114   :  { %122 = vperm.xlu2 %1550, %v1563_v24  }
 0x11b   :  { %209 = vrot.lane.b32.xlu1 %v1797_v37, %s1723_s5 }
 0x123   :  { %213 = vrot.lane.b32.xlu1 %v1815_v42, %s1723_s5 }
 0x16e   :  { %v123_v25 = vpop.permute.xlu2 %122 }
 0x16f   :  { %v142_v27 = vperm.slane %v123_v25, %v1766_v9  ;;  %v126_v35 = vmul.f32 %v123_v25, %v52_v3 }
 0x171   :  { %v134_v39 = vsel %vm84_vm0, %v126_v35, 0.0  ;;  %v1863_v35 = vadd.s32 4294967288, %v1766_v9 }
 0x172   :  { %v135_v41 = vrot.slane %v134_v39, 4 }
 0x174   :  { %v136_v46 = vadd.f32 %v135_v41, %v134_v39 }
 0x176   :  { %v137_v48 = vrot.slane %v136_v46, 2 }
 0x178   :  { %v138_v52 = vadd.f32 %v137_v48, %v136_v46 }
 0x17a   :  { %v139_v58 = vrot.slane %v138_v52, 1 }
 0x185   :  { %v118_v26 = vpop.permute.xlu1 %117 }
 0x186   :  { %v141_v28 = vperm.slane %v118_v26, %v1766_v9  ;;  %v125_v36 = vmul.f32 %v118_v26, %v51_v0  ;;  %v140_v0 = vadd.f32 %v139_v58, %v138_v52 }
 0x188   :  { %v143_v29 = vsel %vm97_vm1, %v142_v27, %v141_v28  ;;  %v127_v40 = vsel %vm84_vm0, %v125_v36, 0.0 }
 0x189   :  { %v145_v30 = vsel %vm100_vm2, %v143_v29, 0.0  ;;  %v128_v44 = vrot.slane %v127_v40, 4 }
 0x18a   :  { %146 = vadd.xlane.f32.xlu2 %v145_v30 }
 0x18b   :  { %v129_v47 = vadd.f32 %v128_v44, %v127_v40 }
 0x18d   :  { %v130_v50 = vrot.slane %v129_v47, 2  ;;  %v1839_v10 = vpop.permute.xlu1 %209 }
 0x18f   :  { %v131_v55 = vadd.f32 %v130_v50, %v129_v47 }
 0x191   :  { %v132_v61 = vrot.slane %v131_v55, 1 }
 0x193   :  { %v133_v2 = vadd.f32 %v132_v61, %v131_v55 }
 0x195   :  { %v1854_v20 = vpop.permute.xlu1 %213 }
 0x1fd   :  { %v147_v45 = vpop.xlane.xlu2 %146 }
 0x1fe   :  { %1564 = vrcp.f32 %v147_v45  ;;  %v159_v54 = vand.u32 2147483648, %v147_v45  ;;  %v157_v57 = vand.u32 2147483647, %v147_v45  ;;  %vm153_vm4 = vweird.f32 %v147_v45 }
 0x200   :  { %v160_v60 = vor.u32 1.1754944e-38, %v159_v54  ;;  %vm158_vm6 = vcmp.eq.f32.partialorder %v157_v57, 8.507059e+37 }
 0x204   :  { %v1565_v49 = vpop.eup %1564 }
 0x205   :  { %v149_v51 = vmul.f32 %v1565_v49, %v147_v45  ;;  %vm154_vm3 = vweird.f32 %v1565_v49 }
 0x206   :  { %vm155_vm5 = vmor %vm153_vm4, %vm154_vm3 }
 0x207   :  { %v150_v53 = vsub.f32 1.0, %v149_v51 }
 0x209   :  { %v151_v56 = vmul.f32 %v1565_v49, %v150_v53 }
 0x20b   :  { %v152_v59 = vadd.f32 %v1565_v49, %v151_v56 }
 0x20d   :  { %v156_v62 = vsel %vm155_vm5, %v1565_v49, %v152_v59 }
 0x20e   :  { %v161_v63 = vsel %vm158_vm6, %v160_v60, %v156_v62 }
 0x20f   :  { %v164_v1 = vrot.slane %v161_v63, 1  ;;  %v167_v4 = vmul.f32 %v161_v63, %v133_v2 }
 0x211   :  { %v168_v3 = vmul.f32 %v164_v1, %v140_v0 }
 0x213   :  { %v173_v5 = vrot.slane %v168_v3, 7 }
 0x215   :  { %v1827_v6 = vsel %vm97_vm1, %v173_v5, %v167_v4 }
 0x216   :  { %1521 = vmatmul.msk.f32.vlgmr.msra.gmra.mxu0 %vm84_vm0, %v1827_v6 }
 0x217   :  { %966 = vmatpush.msra.mxu0 %v1776_v31 }
 0x219   :  { %967 = vmatpush.msra.mxu0 %v1778_v32 }
 0x21b   :  { %968 = vmatpush.msra.mxu0 %v1782_v33 }
 0x21d   :  { %969 = vmatpush.msra.mxu0 %v1786_v34 }
 0x293   :  { %v194_v11 = vpop.f32.mrf.mxu0 }
 0x294   :  { %v1842_v12 = vadd.f32 %v1837_v8, %v194_v11 }
 0x296   :  { %v199_v13 = vperm.slane %v1842_v12, 0  ;;  %v198_v14 = vrot.slane %v1842_v12, 1 }
 0x298   :  { %v220_v16 = vmul.f32 %v1839_v10, %v199_v13  ;;  %v219_v17 = vmul.f32 %v1835_v7, %v199_v13  ;;  %v200_v18 = vperm.slane %v198_v14, 0 }
 0x29a   :  { %229 = vrot.lane.b32.xlu1 %v220_v16, %s1724_s10  ;;  %227 = vrot.lane.b32.xlu0 %v219_v17, %s1724_s10  ;;  %v221_v19 = vmul.f32 %v1846_v15, %v200_v18  ;;  %v222_v21 = vmul.f32 %v1854_v20, %v200_v18 }
 0x29c   :  { %231 = vrot.lane.b32.xlu2 %v221_v19, %s1724_s10 }
 0x2a2   :  { %233 = vrot.lane.b32.xlu0 %v222_v21, %s1724_s10 }
 0x2f6   :  { %v232_v22 = vpop.permute.xlu2 %231 }
 0x2f7   :  { %v246_v23 = vsel %vm84_vm0, %v232_v22, 0.0  ;;  %v1883_v22 = vld [vmem:[#allocation6 + $0x48] sm:$0xff] }
 0x2f8   :  { %247 = vadd.xlane.f32.xlu2 %v246_v23  ;;  %v1885_v23 = vld [vmem:[#allocation6 + $0x40] sm:$0xff]  ;;  %380 = vmatpush.msra.mxu1 %v1883_v22 }
 0x2f9   :  { %634 = vmatpush.msrb.mxu3 %v1883_v22 }
 0x2fa   :  { %381 = vmatpush.msra.mxu1 %v1885_v23 }
 0x2fb   :  { %635 = vmatpush.msrb.mxu3 %v1885_v23 }
 0x30c   :  { %v230_v24 = vpop.permute.xlu1 %229  ;;  %v228_v25 = vpop.permute.xlu0 %227 }
 0x30d   :  { %v243_v26 = vsel %vm242_vm7, %v230_v24, 0.0  ;;  %v239_v27 = vsel %vm84_vm0, %v228_v25, 0.0  ;;  %v1889_v24 = vld [vmem:[#allocation6 + $0x38] sm:$0xff]  ;;  %v1893_v25 = vld [vmem:[#allocation6 + $0x30] sm:$0xff] }
 0x30e   :  { %244 = vadd.xlane.f32.xlu0 %v243_v26  ;;  %240 = vadd.xlane.f32.xlu1 %v239_v27 }
 0x30f   :  { %382 = vmatpush.msra.mxu1 %v1889_v24  ;;  %636 = vmatpush.msrb.mxu3 %v1889_v24 }
 0x311   :  { %383 = vmatpush.msra.mxu1 %v1893_v25  ;;  %637 = vmatpush.msrb.mxu3 %v1893_v25 }
 0x313   :  { %885 = vmatpush.msrb.mxu1 %v1883_v22 }
 0x314   :  { %v234_v28 = vpop.permute.xlu0 %233 }
 0x315   :  { %v249_v29 = vsel %vm242_vm7, %v234_v28, 0.0  ;;  %886 = vmatpush.msrb.mxu1 %v1885_v23 }
 0x316   :  { %250 = vadd.xlane.f32.xlu1 %v249_v29 }
 0x317   :  { %887 = vmatpush.msrb.mxu1 %v1889_v24 }
 0x319   :  { %888 = vmatpush.msrb.mxu1 %v1893_v25 }
 0x36b   :  { %v248_v39 = vpop.xlane.xlu2 %247 }
 0x36c   :  { %v261_v45 = vperm.slane %v248_v39, %v1766_v9 }
 0x381   :  { %v241_v30 = vpop.xlane.xlu1 %240  ;;  %v245_v36 = vpop.xlane.xlu0 %244 }
 0x382   :  { %v256_v40 = vperm.slane %v241_v30, %v1766_v9  ;;  %v258_v41 = vperm.slane %v245_v36, %v1863_v35 }
 0x384   :  { %v260_v47 = vsel %vm259_vm8, %v258_v41, %v256_v40 }
 0x389   :  { %v251_v44 = vpop.xlane.xlu1 %250 }
 0x38a   :  { %v262_v46 = vperm.slane %v251_v44, %v1863_v35 }
 0x38c   :  { %v263_v48 = vsel %vm259_vm8, %v262_v46, %v261_v45 }
 0x38d   :  { %v264_v49 = vsel %vm97_vm1, %v263_v48, %v260_v47 }
 0x38e   :  { %v267_v50 = vsel %vm266_vm9, %v264_v49, -inf }
 0x38f   :  { %268 = vmax.xlane.f32.xlu0 %v267_v50 }
 0x402   :  { %v269_v51 = vpop.xlane.xlu0 %268 }
 0x403   :  { %v271_v52 = vperm.slane %v269_v51, 0  ;;  %v272_v53 = vperm.slane %v269_v51, 1 }
 0x405   :  { %v275_v54 = vsub.f32 %v241_v30, %v271_v52  ;;  %v276_v55 = vsub.f32 %v245_v36, %v271_v52  ;;  %v277_v56 = vsub.f32 %v248_v39, %v272_v53  ;;  %v278_v60 = vsub.f32 %v251_v44, %v272_v53 }
 0x407   :  { %v279_v57 = vmul.f32 1.442695, %v275_v54  ;;  %v281_v58 = vmul.f32 1.442695, %v276_v55  ;;  %v283_v59 = vmul.f32 1.442695, %v277_v56 }
 0x408   :  { %v285_v61 = vmul.f32 1.442695, %v278_v60 }
 0x409   :  { %1566 = vpow2.f32 %v279_v57 }
 0x40a   :  { %1568 = vpow2.f32 %v281_v58 }
 0x40b   :  { %1570 = vpow2.f32 %v283_v59 }
 0x40c   :  { %1572 = vpow2.f32 %v285_v61 }
 0x40f   :  { %v1567_v62 = vpop.eup %1566 }
 0x410   :  { %v1569_v63 = vpop.eup %1568  ;;  %289 = vperm.xlu1 %1549, %v1567_v62  }
 0x411   :  { %v1571_v0 = vpop.eup %1570  ;;  %294 = vperm.xlu0 %1551, %v1569_v63  }
 0x412   :  { %299 = vperm.xlu2 %1550, %v1571_v0   ;;  %v1573_v1 = vpop.eup %1572 }
 0x418   :  { %304 = vperm.xlu1 %1549, %v1573_v1  }
 0x420   :  { %408 = vrot.lane.b32.xlu1 %v1842_v12, %s1725_s11 }
 0x46c   :  { %v300_v4 = vpop.permute.xlu2 %299 }
 0x46d   :  { %v332_v14 = vperm.slane %v300_v4, %v1766_v9  ;;  %v309_v27 = vmul.f32 %v300_v4, %v1820_v43 }
 0x46f   :  { %v320_v36 = vsel %vm84_vm0, %v309_v27, 0.0 }
 0x482   :  { %v290_v2 = vpop.permute.xlu1 %289 }
 0x483   :  { %v295_v3 = vpop.permute.xlu0 %294  ;;  %v329_v11 = vperm.slane %v290_v2, %v1766_v9  ;;  %v307_v29 = vmul.f32 %v290_v2, %v1802_v38 }
 0x484   :  { %v330_v5 = vperm.slane %v295_v3, %v1863_v35  ;;  %v308_v28 = vmul.f32 %v295_v3, %v1797_v37 }
 0x485   :  { %v311_v40 = vsel %vm84_vm0, %v307_v29, 0.0 }
 0x486   :  { %v331_v17 = vsel %vm259_vm8, %v330_v5, %v329_v11  ;;  %v312_v39 = vsel %vm242_vm7, %v308_v28, 0.0 }
 0x487   :  { %v313_v44 = vadd.f32 %v312_v39, %v311_v40 }
 0x489   :  { %v314_v46 = vrot.slane %v313_v44, 4 }
 0x48a   :  { %v305_v13 = vpop.permute.xlu1 %304 }
 0x48b   :  { %v333_v16 = vperm.slane %v305_v13, %v1863_v35  ;;  %v310_v26 = vmul.f32 %v305_v13, %v1815_v42  ;;  %v315_v49 = vadd.f32 %v314_v46, %v313_v44 }
 0x48d   :  { %v334_v18 = vsel %vm259_vm8, %v333_v16, %v332_v14  ;;  %v321_v30 = vsel %vm242_vm7, %v310_v26, 0.0  ;;  %v316_v52 = vrot.slane %v315_v49, 2  ;;  %v1926_v16 = vld [vmem:[#allocation6 + $0x50] ss:$0 sm:$0xff] }
 0x48e   :  { %v335_v19 = vsel %vm97_vm1, %v334_v18, %v331_v17  ;;  %v322_v41 = vadd.f32 %v321_v30, %v320_v36 }
 0x48f   :  { %v337_v21 = vsel %vm266_vm9, %v335_v19, 0.0  ;;  %v317_v57 = vadd.f32 %v316_v52, %v315_v49 }
 0x490   :  { %338 = vadd.xlane.f32.xlu2 %v337_v21  ;;  %v323_v45 = vrot.slane %v322_v41, 4 }
 0x491   :  { %v318_v63 = vrot.slane %v317_v57, 1 }
 0x492   :  { %v324_v48 = vadd.f32 %v323_v45, %v322_v41  ;;  %v409_v46 = vpop.permute.xlu1 %408 }
 0x493   :  { %v319_v4 = vadd.f32 %v318_v63, %v317_v57 }
 0x494   :  { %v325_v50 = vrot.slane %v324_v48, 2 }
 0x496   :  { %v326_v54 = vadd.f32 %v325_v50, %v324_v48 }
 0x498   :  { %v327_v60 = vrot.slane %v326_v54, 1 }
 0x49a   :  { %v328_v2 = vadd.f32 %v327_v60, %v326_v54 }
 0x503   :  { %v339_v47 = vpop.xlane.xlu2 %338 }
 0x504   :  { %1574 = vrcp.f32 %v339_v47  ;;  %v351_v56 = vand.u32 2147483648, %v339_v47  ;;  %v349_v59 = vand.u32 2147483647, %v339_v47  ;;  %vm345_vm11 = vweird.f32 %v339_v47 }
 0x506   :  { %v352_v62 = vor.u32 1.1754944e-38, %v351_v56  ;;  %vm350_vm13 = vcmp.eq.f32.partialorder %v349_v59, 8.507059e+37 }
 0x50a   :  { %v1575_v51 = vpop.eup %1574 }
 0x50b   :  { %v341_v53 = vmul.f32 %v1575_v51, %v339_v47  ;;  %vm346_vm10 = vweird.f32 %v1575_v51 }
 0x50c   :  { %vm347_vm12 = vmor %vm345_vm11, %vm346_vm10 }
 0x50d   :  { %v342_v55 = vsub.f32 1.0, %v341_v53 }
 0x50f   :  { %v343_v58 = vmul.f32 %v1575_v51, %v342_v55 }
 0x511   :  { %v344_v61 = vadd.f32 %v1575_v51, %v343_v58 }
 0x513   :  { %v348_v0 = vsel %vm347_vm12, %v1575_v51, %v344_v61 }
 0x514   :  { %v353_v1 = vsel %vm350_vm13, %v352_v62, %v348_v0 }
 0x515   :  { %v356_v3 = vrot.slane %v353_v1, 1  ;;  %v1913_v11 = vmul.f32 %v353_v1, %v319_v4 }
 0x517   :  { %v1911_v5 = vmul.f32 %v356_v3, %v328_v2 }
 0x519   :  { %v364_v13 = vrot.slane %v1911_v5, 7 }
 0x51b   :  { %v1918_v14 = vsel %vm97_vm1, %v364_v13, %v1913_v11 }
 0x51c   :  { %1522 = vmatmul.msk.f32.vlgmr.msra.gmra.mxu1 %vm84_vm0, %v1918_v14 }
 0x51d   :  { %1387 = vmatpush.msra.mxu1 %v1883_v22 }
 0x51f   :  { %1388 = vmatpush.msra.mxu1 %v1885_v23 }
 0x521   :  { %1389 = vmatpush.msra.mxu1 %v1889_v24 }
 0x523   :  { %1390 = vmatpush.msra.mxu1 %v1893_v25 }
 0x599   :  { %v385_v17 = vpop.f32.mrf.mxu1 }
 0x59a   :  { %v386_v18 = vadd.f32 %v1926_v16, %v385_v17 }
 0x59c   :  { %v388_v19 = vadd.f32 %v386_v18, %v1842_v12 }
 0x59e   :  { %v1523_v21 = vmul.f32 -1.442695, %v388_v19 }
 0x5a0   :  { %1576 = vpow2.f32 %v1523_v21 }
 0x5a6   :  { %v1577_v26 = vpop.eup %1576 }
 0x5a7   :  { %v392_v27 = vadd.f32 1.0, %v1577_v26 }
 0x5a9   :  { %1578 = vrcp.f32 %v392_v27  ;;  %v404_v36 = vand.u32 2147483648, %v392_v27  ;;  %v402_v40 = vand.u32 2147483647, %v392_v27  ;;  %vm398_vm15 = vweird.f32 %v392_v27 }
 0x5ab   :  { %v405_v44 = vor.u32 1.1754944e-38, %v404_v36  ;;  %vm403_vm3 = vcmp.eq.f32.partialorder %v402_v40, 8.507059e+37 }
 0x5af   :  { %v1579_v28 = vpop.eup %1578 }
 0x5b0   :  { %v394_v29 = vmul.f32 %v1579_v28, %v392_v27  ;;  %vm399_vm14 = vweird.f32 %v1579_v28 }
 0x5b1   :  { %vm400_vm2 = vmor %vm398_vm15, %vm399_vm14 }
 0x5b2   :  { %v395_v30 = vsub.f32 1.0, %v394_v29 }
 0x5b4   :  { %v396_v39 = vmul.f32 %v1579_v28, %v395_v30 }
 0x5b6   :  { %v397_v41 = vadd.f32 %v1579_v28, %v396_v39 }
 0x5b8   :  { %v401_v45 = vsel %vm400_vm2, %v1579_v28, %v397_v41 }
 0x5b9   :  { %v406_v12 = vsel %vm403_vm3, %v405_v44, %v401_v45 }
 0x5ba   :  { %v411_v47 = vmul.f32 %v409_v46, %v406_v12  ;;  %v418_v52 = vsub.f32 1.0, %v406_v12 }
 0x5bc   :  { %413 = vrot.lane.b32.xlu1 %v411_v47, %s1725_s11 }
 0x5c4   :  { %424 = vrot.lane.b32.xlu1 %v1827_v6, %s1724_s10 }
 0x62e   :  { %v414_v48 = vpop.permute.xlu1 %413 }
 0x62f   :  { %v416_v49 = vadd.f32 %v414_v48, %v386_v18 }
 0x631   :  { %1580 = vtanh.f32 %v416_v49 }
 0x636   :  { %v425_v51 = vpop.permute.xlu1 %424 }
 0x637   :  { %v1581_v50 = vpop.eup %1580  ;;  %v427_v54 = vmul.f32 %v425_v51, %v406_v12 }
 0x638   :  { %420 = vrot.lane.b32.xlu0 %v1581_v50, %s1723_s5 }
 0x6aa   :  { %v421_v53 = vpop.permute.xlu0 %420 }
 0x6ab   :  { %v423_v55 = vmul.f32 %v421_v53, %v418_v52 }
 0x6ad   :  { %v1934_v56 = vadd.f32 %v427_v54, %v423_v55 }
 0x6af   :  { %448 = vrot.lane.b32.xlu0 %v1934_v56, %s1723_s5 }
 0x721   :  { %v449_v57 = vpop.permute.xlu0 %448 }
 0x722   :  { %1525 = vmatmul.msk.f32.vlgmr.msra.gmra.mxu3 %vm84_vm0, %v449_v57 }
 0x723   :  { %1136 = vmatpush.msra.mxu3 %v1883_v22 }
 0x725   :  { %1137 = vmatpush.msra.mxu3 %v1885_v23 }
 0x727   :  { %1138 = vmatpush.msra.mxu3 %v1889_v24 }
 0x729   :  { %1139 = vmatpush.msra.mxu3 %v1893_v25 }
 0x7a5   :  { %v469_v6 = vpop.f32.mrf.mxu3 }
 0x7a6   :  { %v1944_v58 = vadd.f32 %v1837_v8, %v469_v6 }
 0x7a8   :  { %v474_v59 = vperm.slane %v1944_v58, 0  ;;  %v473_v62 = vrot.slane %v1944_v58, 1 }
 0x7aa   :  { %v479_v60 = vmul.f32 %v474_v59, %v1839_v10  ;;  %v478_v61 = vmul.f32 %v474_v59, %v1835_v7  ;;  %v475_v22 = vperm.slane %v473_v62, 0 }
 0x7ac   :  { %488 = vrot.lane.b32.xlu0 %v479_v60, %s1724_s10  ;;  %486 = vrot.lane.b32.xlu1 %v478_v61, %s1724_s10  ;;  %v481_v23 = vmul.f32 %v475_v22, %v1854_v20  ;;  %v480_v24 = vmul.f32 %v475_v22, %v1846_v15 }
 0x7b4   :  { %492 = vrot.lane.b32.xlu0 %v481_v23, %s1724_s10  ;;  %490 = vrot.lane.b32.xlu1 %v480_v24, %s1724_s10 }
 0x81e   :  { %v489_v25 = vpop.permute.xlu0 %488  ;;  %v487_v63 = vpop.permute.xlu1 %486 }
 0x81f   :  { %v498_v0 = vsel %vm84_vm0, %v487_v63, 0.0  ;;  %v501_v1 = vsel %vm242_vm7, %v489_v25, 0.0 }
 0x820   :  { %499 = vadd.xlane.f32.xlu2 %v498_v0  ;;  %502 = vadd.xlane.f32.xlu1 %v501_v1 }
 0x826   :  { %v493_v2 = vpop.permute.xlu0 %492  ;;  %v491_v3 = vpop.permute.xlu1 %490 }
 0x827   :  { %v507_v4 = vsel %vm242_vm7, %v493_v2, 0.0  ;;  %v504_v13 = vsel %vm84_vm0, %v491_v3, 0.0 }
 0x828   :  { %508 = vadd.xlane.f32.xlu2 %v507_v4  ;;  %505 = vadd.xlane.f32.xlu0 %v504_v13 }
 0x893   :  { %v500_v17 = vpop.xlane.xlu2 %499  ;;  %v503_v18 = vpop.xlane.xlu1 %502 }
 0x894   :  { %v514_v19 = vperm.slane %v500_v17, %v1766_v9  ;;  %v515_v21 = vperm.slane %v503_v18, %v1863_v35 }
 0x896   :  { %v516_v30 = vsel %vm259_vm8, %v515_v21, %v514_v19 }
 0x89b   :  { %v509_v26 = vpop.xlane.xlu2 %508  ;;  %v506_v27 = vpop.xlane.xlu0 %505 }
 0x89c   :  { %v518_v28 = vperm.slane %v509_v26, %v1863_v35  ;;  %v517_v29 = vperm.slane %v506_v27, %v1766_v9 }
 0x89e   :  { %v519_v36 = vsel %vm259_vm8, %v518_v28, %v517_v29 }
 0x89f   :  { %v520_v39 = vsel %vm97_vm1, %v519_v36, %v516_v30 }
 0x8a0   :  { %v522_v40 = vsel %vm266_vm9, %v520_v39, -inf }
 0x8a1   :  { %523 = vmax.xlane.f32.xlu2 %v522_v40 }
 0x914   :  { %v524_v41 = vpop.xlane.xlu2 %523 }
 0x915   :  { %v526_v44 = vperm.slane %v524_v41, 0  ;;  %v527_v45 = vperm.slane %v524_v41, 1 }
 0x917   :  { %v530_v46 = vsub.f32 %v500_v17, %v526_v44  ;;  %v531_v12 = vsub.f32 %v503_v18, %v526_v44  ;;  %v532_v47 = vsub.f32 %v506_v27, %v527_v45  ;;  %v533_v51 = vsub.f32 %v509_v26, %v527_v45 }
 0x919   :  { %v534_v48 = vmul.f32 1.442695, %v530_v46  ;;  %v536_v49 = vmul.f32 1.442695, %v531_v12  ;;  %v538_v50 = vmul.f32 1.442695, %v532_v47 }
 0x91a   :  { %v540_v52 = vmul.f32 1.442695, %v533_v51 }
 0x91b   :  { %1582 = vpow2.f32 %v534_v48 }
 0x91c   :  { %1584 = vpow2.f32 %v536_v49 }
 0x91d   :  { %1586 = vpow2.f32 %v538_v50 }
 0x91e   :  { %1588 = vpow2.f32 %v540_v52 }
 0x921   :  { %v1583_v53 = vpop.eup %1582 }
 0x922   :  { %v1585_v54 = vpop.eup %1584  ;;  %544 = vperm.xlu2 %1550, %v1583_v53  }
 0x923   :  { %v1587_v55 = vpop.eup %1586  ;;  %549 = vperm.xlu1 %1549, %v1585_v54  }
 0x924   :  { %554 = vperm.xlu0 %1551, %v1587_v55   ;;  %v1589_v57 = vpop.eup %1588 }
 0x92a   :  { %559 = vperm.xlu2 %1550, %v1589_v57  }
 0x92c   :  { %662 = vrot.lane.b32.xlu0 %v1944_v58, %s1725_s11 }
 0x97c   :  { %v545_v6 = vpop.permute.xlu2 %544 }
 0x97d   :  { %v584_v61 = vperm.slane %v545_v6, %v1766_v9  ;;  %v562_v3 = vmul.f32 %v545_v6, %v1802_v38  ;;  %v1991_v6 = vstv %s1986_s12 }
 0x97f   :  { %v566_v18 = vsel %vm84_vm0, %v562_v3, 0.0 }
 0x984   :  { %v560_v59 = vpop.permute.xlu2 %559 }
 0x985   :  { %v588_v23 = vperm.slane %v560_v59, %v1863_v35  ;;  %v565_v13 = vmul.f32 %v560_v59, %v1815_v42 }
 0x987   :  { %v576_v26 = vsel %vm242_vm7, %v565_v13, 0.0 }
 0x995   :  { %v550_v60 = vpop.permute.xlu1 %549 }
 0x996   :  { %v555_v62 = vpop.permute.xlu0 %554  ;;  %v585_v22 = vperm.slane %v550_v60, %v1863_v35  ;;  %v563_v2 = vmul.f32 %v550_v60, %v1797_v37  ;;  %v1994_v60 = vstv %s1988_s13 }
 0x997   :  { %v587_v24 = vperm.slane %v555_v62, %v1766_v9  ;;  %v564_v4 = vmul.f32 %v555_v62, %v1820_v43 }
 0x998   :  { %v586_v25 = vsel %vm259_vm8, %v585_v22, %v584_v61  ;;  %v567_v17 = vsel %vm242_vm7, %v563_v2, 0.0 }
 0x999   :  { %v589_v63 = vsel %vm259_vm8, %v588_v23, %v587_v24  ;;  %v575_v19 = vsel %vm84_vm0, %v564_v4, 0.0  ;;  %v568_v21 = vadd.f32 %v567_v17, %v566_v18  ;;  %v432_v23 = vmul.f32 %v1991_v6, %v1913_v11 }
 0x99a   :  { %v590_v0 = vsel %vm97_vm1, %v589_v63, %v586_v25  ;;  %v577_v27 = vadd.f32 %v576_v26, %v575_v19  ;;  %v433_v63 = vmul.f32 %v1991_v6, %v1911_v5 }
 0x99b   :  { %v592_v1 = vsel %vm266_vm9, %v590_v0, 0.0  ;;  %v569_v28 = vrot.slane %v568_v21, 4 }
 0x99c   :  { %593 = vadd.xlane.f32.xlu2 %v592_v1  ;;  %v578_v29 = vrot.slane %v577_v27, 4 }
 0x99d   :  { %v570_v30 = vadd.f32 %v569_v28, %v568_v21 }
 0x99e   :  { %v579_v39 = vadd.f32 %v578_v29, %v577_v27 }
 0x99f   :  { %v571_v40 = vrot.slane %v570_v30, 2 }
 0x9a0   :  { %v580_v41 = vrot.slane %v579_v39, 2 }
 0x9a1   :  { %v572_v45 = vadd.f32 %v571_v40, %v570_v30 }
 0x9a2   :  { %v581_v12 = vadd.f32 %v580_v41, %v579_v39  ;;  %v663_v41 = vpop.permute.xlu0 %662 }
 0x9a3   :  { %v573_v49 = vrot.slane %v572_v45, 1 }
 0x9a4   :  { %v582_v52 = vrot.slane %v581_v12, 1 }
 0x9a5   :  { %v574_v55 = vadd.f32 %v573_v49, %v572_v45 }
 0x9a6   :  { %v583_v61 = vadd.f32 %v582_v52, %v581_v12 }
 0xa0f   :  { %v594_v36 = vpop.xlane.xlu2 %593 }
 0xa10   :  { %1590 = vrcp.f32 %v594_v36  ;;  %v606_v48 = vand.u32 2147483648, %v594_v36  ;;  %v604_v51 = vand.u32 2147483647, %v594_v36  ;;  %vm600_vm5 = vweird.f32 %v594_v36 }
 0xa12   :  { %v607_v54 = vor.u32 1.1754944e-38, %v606_v48  ;;  %vm605_vm10 = vcmp.eq.f32.partialorder %v604_v51, 8.507059e+37 }
 0xa16   :  { %v1591_v44 = vpop.eup %1590 }
 0xa17   :  { %v596_v46 = vmul.f32 %v1591_v44, %v594_v36  ;;  %vm601_vm4 = vweird.f32 %v1591_v44 }
 0xa18   :  { %vm602_vm6 = vmor %vm600_vm5, %vm601_vm4 }
 0xa19   :  { %v597_v47 = vsub.f32 1.0, %v596_v46 }
 0xa1b   :  { %v598_v50 = vmul.f32 %v1591_v44, %v597_v47 }
 0xa1d   :  { %v599_v53 = vadd.f32 %v1591_v44, %v598_v50 }
 0xa1f   :  { %v603_v57 = vsel %vm602_vm6, %v1591_v44, %v599_v53 }
 0xa20   :  { %v608_v59 = vsel %vm605_vm10, %v607_v54, %v603_v57 }
 0xa21   :  { %v611_v62 = vrot.slane %v608_v59, 1  ;;  %v614_v22 = vmul.f32 %v608_v59, %v574_v55 }
 0xa23   :  { %v615_v24 = vmul.f32 %v611_v62, %v583_v61  ;;  %v683_v25 = vmul.f32 %v1994_v60, %v614_v22 }
 0xa25   :  { %v618_v0 = vrot.slane %v615_v24, 7  ;;  %v684_v1 = vmul.f32 %v1994_v60, %v615_v24  ;;  %v2002_v2 = vadd.f32 %v683_v25, %v432_v23 }
 0xa27   :  { %v2005_v3 = vsel %vm97_vm1, %v618_v0, %v614_v22  ;;  %v2007_v4 = vadd.f32 %v684_v1, %v433_v63 }
 0xa28   :  { %1526 = vmatmul.msk.f32.vlgmr.msrb.gmra.mxu3 %vm84_vm0, %v2005_v3 }
 0xaab   :  { %v639_v11 = vpop.f32.mrf.mxu3 }
 0xaac   :  { %v640_v13 = vadd.f32 %v1926_v16, %v639_v11 }
 0xaae   :  { %v642_v17 = vadd.f32 %v640_v13, %v1944_v58 }
 0xab0   :  { %v1527_v18 = vmul.f32 -1.442695, %v642_v17 }
 0xab2   :  { %1592 = vpow2.f32 %v1527_v18 }
 0xab8   :  { %v1593_v5 = vpop.eup %1592 }
 0xab9   :  { %v646_v19 = vadd.f32 1.0, %v1593_v5 }
 0xabb   :  { %1594 = vrcp.f32 %v646_v19  ;;  %v658_v28 = vand.u32 2147483648, %v646_v19  ;;  %v656_v30 = vand.u32 2147483647, %v646_v19  ;;  %vm652_vm12 = vweird.f32 %v646_v19 }
 0xabd   :  { %v659_v39 = vor.u32 1.1754944e-38, %v658_v28  ;;  %vm657_vm14 = vcmp.eq.f32.partialorder %v656_v30, 8.507059e+37 }
 0xac1   :  { %v1595_v21 = vpop.eup %1594 }
 0xac2   :  { %v648_v26 = vmul.f32 %v1595_v21, %v646_v19  ;;  %vm653_vm11 = vweird.f32 %v1595_v21 }
 0xac3   :  { %vm654_vm13 = vmor %vm652_vm12, %vm653_vm11 }
 0xac4   :  { %v649_v27 = vsub.f32 1.0, %v648_v26 }
 0xac6   :  { %v650_v29 = vmul.f32 %v1595_v21, %v649_v27 }
 0xac8   :  { %v651_v36 = vadd.f32 %v1595_v21, %v650_v29 }
 0xaca   :  { %v655_v40 = vsel %vm654_vm13, %v1595_v21, %v651_v36 }
 0xacb   :  { %v660_v58 = vsel %vm657_vm14, %v659_v39, %v655_v40 }
 0xacc   :  { %v665_v44 = vmul.f32 %v663_v41, %v660_v58  ;;  %v672_v47 = vsub.f32 1.0, %v660_v58  ;;  %v678_v49 = vmul.f32 %v660_v58, %v1934_v56 }
 0xace   :  { %667 = vrot.lane.b32.xlu1 %v665_v44, %s1725_s11 }
 0xb40   :  { %v668_v45 = vpop.permute.xlu1 %667 }
 0xb41   :  { %v670_v46 = vadd.f32 %v668_v45, %v640_v13 }
 0xb43   :  { %1596 = vtanh.f32 %v670_v46 }
 0xb49   :  { %v1597_v12 = vpop.eup %1596 }
 0xb4a   :  { %674 = vrot.lane.b32.xlu0 %v1597_v12, %s1723_s5 }
 0xbbc   :  { %v675_v48 = vpop.permute.xlu0 %674 }
 0xbbd   :  { %v677_v50 = vmul.f32 %v675_v48, %v672_v47 }
 0xbbf   :  { %v2016_v51 = vadd.f32 %v678_v49, %v677_v50 }
 0xbc1   :  { %699 = vrot.lane.b32.xlu1 %v2016_v51, %s1723_s5 }
 0xc33   :  { %v700_v52 = vpop.permute.xlu1 %699 }
 0xc34   :  { %1529 = vmatmul.msk.f32.vlgmr.msrb.gmra.mxu0 %vm84_vm0, %v700_v52 }
 0xc35   :  { %1217 = vmatpush.msrb.mxu0 %v1776_v31 }
 0xc37   :  { %1218 = vmatpush.msrb.mxu0 %v1778_v32 }
 0xc39   :  { %1219 = vmatpush.msrb.mxu0 %v1782_v33 }
 0xc3b   :  { %1220 = vmatpush.msrb.mxu0 %v1786_v34 }
 0xcb1   :  { %v720_v53 = vpop.f32.mrf.mxu0 }
 0xcb2   :  { %v2026_v54 = vadd.f32 %v1837_v8, %v720_v53 }
 0xcb4   :  { %v725_v55 = vperm.slane %v2026_v54, 0  ;;  %v724_v61 = vrot.slane %v2026_v54, 1 }
 0xcb6   :  { %v730_v57 = vmul.f32 %v725_v55, %v1839_v10  ;;  %v729_v59 = vmul.f32 %v725_v55, %v1835_v7  ;;  %v726_v31 = vperm.slane %v724_v61, 0 }
 0xcb8   :  { %739 = vrot.lane.b32.xlu1 %v730_v57, %s1724_s10  ;;  %737 = vrot.lane.b32.xlu0 %v729_v59, %s1724_s10  ;;  %v732_v32 = vmul.f32 %v726_v31, %v1854_v20  ;;  %v731_v33 = vmul.f32 %v726_v31, %v1846_v15 }
 0xcc0   :  { %743 = vrot.lane.b32.xlu1 %v732_v32, %s1724_s10  ;;  %741 = vrot.lane.b32.xlu0 %v731_v33, %s1724_s10 }
 0xd2a   :  { %v740_v34 = vpop.permute.xlu1 %739  ;;  %v738_v8 = vpop.permute.xlu0 %737 }
 0xd2b   :  { %v752_v62 = vsel %vm242_vm7, %v740_v34, 0.0  ;;  %v749_v22 = vsel %vm84_vm0, %v738_v8, 0.0 }
 0xd2c   :  { %753 = vadd.xlane.f32.xlu2 %v752_v62  ;;  %750 = vadd.xlane.f32.xlu0 %v749_v22 }
 0xd32   :  { %v744_v23 = vpop.permute.xlu1 %743  ;;  %v742_v24 = vpop.permute.xlu0 %741 }
 0xd33   :  { %v758_v25 = vsel %vm242_vm7, %v744_v23, 0.0  ;;  %v755_v63 = vsel %vm84_vm0, %v742_v24, 0.0 }
 0xd34   :  { %759 = vadd.xlane.f32.xlu2 %v758_v25  ;;  %756 = vadd.xlane.f32.xlu1 %v755_v63 }
 0xd9f   :  { %v754_v0 = vpop.xlane.xlu2 %753  ;;  %v751_v1 = vpop.xlane.xlu0 %750 }
 0xda0   :  { %v766_v11 = vperm.slane %v754_v0, %v1863_v35  ;;  %v765_v13 = vperm.slane %v751_v1, %v1766_v9 }
 0xda2   :  { %v767_v21 = vsel %vm259_vm8, %v766_v11, %v765_v13 }
 0xda7   :  { %v760_v17 = vpop.xlane.xlu2 %759  ;;  %v757_v18 = vpop.xlane.xlu1 %756 }
 0xda8   :  { %v769_v5 = vperm.slane %v760_v17, %v1863_v35  ;;  %v768_v19 = vperm.slane %v757_v18, %v1766_v9 }
 0xdaa   :  { %v770_v26 = vsel %vm259_vm8, %v769_v5, %v768_v19 }
 0xdab   :  { %v771_v27 = vsel %vm97_vm1, %v770_v26, %v767_v21 }
 0xdac   :  { %v773_v28 = vsel %vm266_vm9, %v771_v27, -inf }
 0xdad   :  { %774 = vmax.xlane.f32.xlu2 %v773_v28 }
 0xe20   :  { %v775_v29 = vpop.xlane.xlu2 %774 }
 0xe21   :  { %v777_v30 = vperm.slane %v775_v29, 0  ;;  %v778_v36 = vperm.slane %v775_v29, 1 }
 0xe23   :  { %v781_v39 = vsub.f32 %v751_v1, %v777_v30  ;;  %v782_v40 = vsub.f32 %v754_v0, %v777_v30  ;;  %v783_v41 = vsub.f32 %v757_v18, %v778_v36  ;;  %v784_v46 = vsub.f32 %v760_v17, %v778_v36 }
 0xe25   :  { %v785_v58 = vmul.f32 1.442695, %v781_v39  ;;  %v787_v44 = vmul.f32 1.442695, %v782_v40  ;;  %v789_v45 = vmul.f32 1.442695, %v783_v41 }
 0xe26   :  { %v791_v12 = vmul.f32 1.442695, %v784_v46 }
 0xe27   :  { %1598 = vpow2.f32 %v785_v58 }
 0xe28   :  { %1600 = vpow2.f32 %v787_v44 }
 0xe29   :  { %1602 = vpow2.f32 %v789_v45 }
 0xe2a   :  { %1604 = vpow2.f32 %v791_v12 }
 0xe2d   :  { %v1599_v47 = vpop.eup %1598 }
 0xe2e   :  { %v1601_v48 = vpop.eup %1600  ;;  %795 = vperm.xlu2 %1550, %v1599_v47   ;;  %v2071_v47 = vstv %s2068_s14 }
 0xe2f   :  { %v1603_v49 = vpop.eup %1602  ;;  %800 = vperm.xlu0 %1551, %v1601_v48  }
 0xe30   :  { %805 = vperm.xlu1 %1549, %v1603_v49   ;;  %v1605_v50 = vpop.eup %1604 }
 0xe36   :  { %810 = vperm.xlu2 %1550, %v1605_v50  }
 0xe37   :  { %913 = vrot.lane.b32.xlu0 %v2026_v54, %s1725_s11 }
 0xe88   :  { %v796_v52 = vpop.permute.xlu2 %795 }
 0xe89   :  { %v813_v53 = vmul.f32 %v796_v52, %v1802_v38  ;;  %v835_v59 = vperm.slane %v796_v52, %v1766_v9 }
 0xe8b   :  { %v817_v8 = vsel %vm84_vm0, %v813_v53, 0.0 }
 0xe90   :  { %v811_v55 = vpop.permute.xlu2 %810 }
 0xe91   :  { %v839_v33 = vperm.slane %v811_v55, %v1863_v35  ;;  %v816_v63 = vmul.f32 %v811_v55, %v1815_v42 }
 0xe93   :  { %v827_v1 = vsel %vm242_vm7, %v816_v63, 0.0 }
 0xea1   :  { %v801_v57 = vpop.permute.xlu0 %800 }
 0xea2   :  { %v806_v61 = vpop.permute.xlu1 %805  ;;  %v814_v31 = vmul.f32 %v801_v57, %v1797_v37  ;;  %v836_v32 = vperm.slane %v801_v57, %v1863_v35 }
 0xea3   :  { %v838_v34 = vperm.slane %v806_v61, %v1766_v9  ;;  %v815_v37 = vmul.f32 %v806_v61, %v1820_v43 }
 0xea4   :  { %v818_v62 = vsel %vm242_vm7, %v814_v31, 0.0  ;;  %v837_v22 = vsel %vm259_vm8, %v836_v32, %v835_v59 }
 0xea5   :  { %v819_v38 = vadd.f32 %v818_v62, %v817_v8  ;;  %v840_v23 = vsel %vm259_vm8, %v839_v33, %v838_v34  ;;  %v826_v0 = vsel %vm84_vm0, %v815_v37, 0.0 }
 0xea6   :  { %v841_v24 = vsel %vm97_vm1, %v840_v23, %v837_v22  ;;  %v828_v11 = vadd.f32 %v827_v1, %v826_v0 }
 0xea7   :  { %v843_v25 = vsel %vm266_vm9, %v841_v24, 0.0  ;;  %v820_v13 = vrot.slane %v819_v38, 4 }
 0xea8   :  { %844 = vadd.xlane.f32.xlu2 %v843_v25  ;;  %v829_v17 = vrot.slane %v828_v11, 4 }
 0xea9   :  { %v821_v18 = vadd.f32 %v820_v13, %v819_v38  ;;  %v914_v1 = vpop.permute.xlu0 %913 }
 0xeaa   :  { %v830_v19 = vadd.f32 %v829_v17, %v828_v11 }
 0xeab   :  { %v822_v21 = vrot.slane %v821_v18, 2 }
 0xeac   :  { %v831_v26 = vrot.slane %v830_v19, 2 }
 0xead   :  { %v823_v28 = vadd.f32 %v822_v21, %v821_v18 }
 0xeae   :  { %v832_v43 = vadd.f32 %v831_v26, %v830_v19 }
 0xeaf   :  { %v824_v36 = vrot.slane %v823_v28, 1 }
 0xeb0   :  { %v833_v41 = vrot.slane %v832_v43, 1 }
 0xeb1   :  { %v825_v45 = vadd.f32 %v824_v36, %v823_v28 }
 0xeb2   :  { %v834_v48 = vadd.f32 %v833_v41, %v832_v43  ;;  %v2096_v43 = vld [vmem:[#allocation6 + $0x28] ss:$0 sm:$0xff] }
 0xf1b   :  { %v845_v5 = vpop.xlane.xlu2 %844 }
 0xf1c   :  { %1606 = vrcp.f32 %v845_v5  ;;  %v857_v30 = vand.u32 2147483648, %v845_v5  ;;  %v855_v40 = vand.u32 2147483647, %v845_v5  ;;  %vm851_vm2 = vweird.f32 %v845_v5 }
 0xf1e   :  { %v858_v44 = vor.u32 1.1754944e-38, %v857_v30  ;;  %vm856_vm4 = vcmp.eq.f32.partialorder %v855_v40, 8.507059e+37 }
 0xf22   :  { %v1607_v27 = vpop.eup %1606 }
 0xf23   :  { %v847_v29 = vmul.f32 %v1607_v27, %v845_v5  ;;  %vm852_vm15 = vweird.f32 %v1607_v27 }
 0xf24   :  { %vm853_vm3 = vmor %vm851_vm2, %vm852_vm15 }
 0xf25   :  { %v848_v42 = vsub.f32 1.0, %v847_v29 }
 0xf27   :  { %v849_v39 = vmul.f32 %v1607_v27, %v848_v42 }
 0xf29   :  { %v850_v58 = vadd.f32 %v1607_v27, %v849_v39 }
 0xf2b   :  { %v854_v46 = vsel %vm853_vm3, %v1607_v27, %v850_v58 }
 0xf2c   :  { %v859_v12 = vsel %vm856_vm4, %v858_v44, %v854_v46 }
 0xf2d   :  { %v862_v49 = vrot.slane %v859_v12, 1  ;;  %v865_v50 = vmul.f32 %v859_v12, %v825_v45 }
 0xf2f   :  { %v866_v52 = vmul.f32 %v862_v49, %v834_v48  ;;  %v934_v53 = vmul.f32 %v2071_v47, %v865_v50 }
 0xf31   :  { %v869_v55 = vrot.slane %v866_v52, 7  ;;  %v935_v57 = vmul.f32 %v2071_v47, %v866_v52  ;;  %v2076_v59 = vadd.f32 %v934_v53, %v2002_v2 }
 0xf33   :  { %v2079_v61 = vsel %vm97_vm1, %v869_v55, %v865_v50  ;;  %v2082_v31 = vadd.f32 %v935_v57, %v2007_v4 }
 0xf34   :  { %1530 = vmatmul.msk.f32.vlgmr.msrb.gmra.mxu1 %vm84_vm0, %v2079_v61 }
 0xfb1   :  { %v890_v32 = vpop.f32.mrf.mxu1 }
 0xfb2   :  { %v891_v33 = vadd.f32 %v1926_v16, %v890_v32 }
 0xfb4   :  { %v893_v34 = vadd.f32 %v891_v33, %v2026_v54 }
 0xfb6   :  { %v1531_v8 = vmul.f32 -1.442695, %v893_v34 }
 0xfb8   :  { %1608 = vpow2.f32 %v1531_v8 }
 0xfbe   :  { %v1609_v62 = vpop.eup %1608 }
 0xfbf   :  { %v897_v22 = vadd.f32 1.0, %v1609_v62 }
 0xfc1   :  { %1610 = vrcp.f32 %v897_v22  ;;  %v909_v24 = vand.u32 2147483648, %v897_v22  ;;  %v907_v4 = vand.u32 2147483647, %v897_v22  ;;  %vm903_vm6 = vweird.f32 %v897_v22 }
 0xfc3   :  { %v910_v63 = vor.u32 1.1754944e-38, %v909_v24  ;;  %vm908_vm11 = vcmp.eq.f32.partialorder %v907_v4, 8.507059e+37 }
 0xfc7   :  { %v1611_v2 = vpop.eup %1610 }
 0xfc8   :  { %v899_v38 = vmul.f32 %v1611_v2, %v897_v22  ;;  %vm904_vm5 = vweird.f32 %v1611_v2 }
 0xfc9   :  { %vm905_vm10 = vmor %vm903_vm6, %vm904_vm5 }
 0xfca   :  { %v900_v23 = vsub.f32 1.0, %v899_v38 }
 0xfcc   :  { %v901_v25 = vmul.f32 %v1611_v2, %v900_v23 }
 0xfce   :  { %v902_v37 = vadd.f32 %v1611_v2, %v901_v25 }
 0xfd0   :  { %v906_v0 = vsel %vm905_vm10, %v1611_v2, %v902_v37 }
 0xfd1   :  { %v911_v54 = vsel %vm908_vm11, %v910_v63, %v906_v0 }
 0xfd2   :  { %v916_v11 = vmul.f32 %v914_v1, %v911_v54  ;;  %v923_v5 = vsub.f32 1.0, %v911_v54  ;;  %v929_v21 = vmul.f32 %v911_v54, %v2016_v51 }
 0xfd4   :  { %918 = vrot.lane.b32.xlu0 %v916_v11, %s1725_s11 }
0x1046   :  { %v919_v13 = vpop.permute.xlu0 %918 }
0x1047   :  { %v921_v17 = vadd.f32 %v919_v13, %v891_v33 }
0x1049   :  { %1612 = vtanh.f32 %v921_v17 }
0x104f   :  { %v1613_v18 = vpop.eup %1612 }
0x1050   :  { %925 = vrot.lane.b32.xlu1 %v1613_v18, %s1723_s5 }
0x10c2   :  { %v926_v19 = vpop.permute.xlu1 %925 }
0x10c3   :  { %v928_v26 = vmul.f32 %v926_v19, %v923_v5 }
0x10c5   :  { %v2091_v27 = vadd.f32 %v929_v21, %v928_v26 }
0x10c7   :  { %950 = vrot.lane.b32.xlu0 %v2091_v27, %s1723_s5 }
0x1139   :  { %v951_v28 = vpop.permute.xlu0 %950 }
0x113a   :  { %1533 = vmatmul.msk.f32.vlgmr.msra.gmra.mxu0 %vm84_vm0, %v951_v28 }
0x11b7   :  { %v971_v29 = vpop.f32.mrf.mxu0 }
0x11b8   :  { %v2099_v42 = vadd.f32 %v2096_v43, %v971_v29  ;;  %v2128_v29 = vld [vmem:[%s2300_s1] sm:$0xff] }
0x11ba   :  { %v976_v30 = vperm.slane %v2099_v42, 0  ;;  %v975_v40 = vrot.slane %v2099_v42, 1 }
0x11bc   :  { %v981_v36 = vmul.f32 %v976_v30, %v1839_v10  ;;  %v980_v39 = vmul.f32 %v976_v30, %v1835_v7  ;;  %v977_v41 = vperm.slane %v975_v40, 0 }
0x11be   :  { %990 = vrot.lane.b32.xlu0 %v981_v36, %s1724_s10  ;;  %988 = vrot.lane.b32.xlu1 %v980_v39, %s1724_s10  ;;  %v983_v58 = vmul.f32 %v977_v41, %v1854_v20  ;;  %v982_v44 = vmul.f32 %v977_v41, %v1846_v15 }
0x11c6   :  { %994 = vrot.lane.b32.xlu0 %v983_v58, %s1724_s10  ;;  %992 = vrot.lane.b32.xlu1 %v982_v44, %s1724_s10  ;;  %v2135_v58 = vld [vmem:[%s2300_s1 + $0x8] sm:$0x3] }
0x1230   :  { %v991_v45 = vpop.permute.xlu0 %990  ;;  %v989_v46 = vpop.permute.xlu1 %988 }
0x1231   :  { %v1003_v12 = vsel %vm242_vm7, %v991_v45, 0.0  ;;  %v1000_v48 = vsel %vm84_vm0, %v989_v46, 0.0 }
0x1232   :  { %1004 = vadd.xlane.f32.xlu2 %v1003_v12  ;;  %1001 = vadd.xlane.f32.xlu1 %v1000_v48 }
0x1238   :  { %v995_v49 = vpop.permute.xlu0 %994  ;;  %v993_v50 = vpop.permute.xlu1 %992 }
0x1239   :  { %v1009_v52 = vsel %vm242_vm7, %v995_v49, 0.0  ;;  %v1006_v53 = vsel %vm84_vm0, %v993_v50, 0.0 }
0x123a   :  { %1010 = vadd.xlane.f32.xlu2 %v1009_v52  ;;  %1007 = vadd.xlane.f32.xlu0 %v1006_v53 }
0x12a5   :  { %v1005_v55 = vpop.xlane.xlu2 %1004  ;;  %v1002_v57 = vpop.xlane.xlu1 %1001 }
0x12a6   :  { %v1017_v32 = vperm.slane %v1005_v55, %v1863_v35  ;;  %v1016_v33 = vperm.slane %v1002_v57, %v1766_v9 }
0x12a8   :  { %v1018_v2 = vsel %vm259_vm8, %v1017_v32, %v1016_v33  ;;  %v2150_v32 = vld [vmem:[%s2300_s1 + $0x10] sm:$0xff] }
0x12ad   :  { %v1011_v34 = vpop.xlane.xlu2 %1010  ;;  %v1008_v8 = vpop.xlane.xlu0 %1007 }
0x12ae   :  { %v1020_v62 = vperm.slane %v1011_v34, %v1863_v35  ;;  %v1019_v22 = vperm.slane %v1008_v8, %v1766_v9 }
0x12b0   :  { %v1021_v38 = vsel %vm259_vm8, %v1020_v62, %v1019_v22 }
0x12b1   :  { %v1022_v23 = vsel %vm97_vm1, %v1021_v38, %v1018_v2 }
0x12b2   :  { %v1024_v24 = vsel %vm266_vm9, %v1022_v23, -inf }
0x12b3   :  { %1025 = vmax.xlane.f32.xlu2 %v1024_v24 }
0x1326   :  { %v1026_v25 = vpop.xlane.xlu2 %1025 }
0x1327   :  { %v1028_v4 = vperm.slane %v1026_v25, 0  ;;  %v1029_v37 = vperm.slane %v1026_v25, 1 }
0x1329   :  { %v1032_v63 = vsub.f32 %v1002_v57, %v1028_v4  ;;  %v1033_v0 = vsub.f32 %v1005_v55, %v1028_v4  ;;  %v1034_v1 = vsub.f32 %v1008_v8, %v1029_v37  ;;  %v1035_v17 = vsub.f32 %v1011_v34, %v1029_v37  ;;  %v2156_v34 = vld [vmem:[%s2300_s1 + $0x18] sm:$0x3]  ;;  %s2161_s1 = sld [smem:[#allocation2 + $0x3]] }
0x132b   :  { %v1036_v54 = vmul.f32 1.442695, %v1032_v63  ;;  %v1038_v11 = vmul.f32 1.442695, %v1033_v0  ;;  %v1040_v13 = vmul.f32 1.442695, %v1034_v1 }
0x132c   :  { %v1042_v18 = vmul.f32 1.442695, %v1035_v17 }
0x132d   :  { %1614 = vpow2.f32 %v1036_v54 }
0x132e   :  { %1616 = vpow2.f32 %v1038_v11 }
0x132f   :  { %1618 = vpow2.f32 %v1040_v13  ;;  %s1452_s0 = sadd.f32 %s2161_s1, %s1451_s25 }
0x1330   :  { %1620 = vpow2.f32 %v1042_v18 }
0x1331   :  { %s1453_s26 = sadd.f32 %s2238_s23, %s1452_s0 }
0x1333   :  { %v1615_v5 = vpop.eup %1614 }
0x1334   :  { %v1617_v19 = vpop.eup %1616  ;;  %1046 = vperm.xlu2 %1550, %v1615_v5  }
0x1335   :  { %v1619_v21 = vpop.eup %1618  ;;  %1051 = vperm.xlu1 %1549, %v1617_v19  }
0x1336   :  { %1056 = vperm.xlu0 %1551, %v1619_v21   ;;  %v1621_v26 = vpop.eup %1620 }
0x133c   :  { %1061 = vperm.xlu2 %1550, %v1621_v26  }
0x133d   :  { %1164 = vrot.lane.b32.xlu1 %v2099_v42, %s1725_s11 }
0x138e   :  { %v1047_v28 = vpop.permute.xlu2 %1046 }
0x138f   :  { %v1064_v30 = vmul.f32 %v2128_v29, %v1047_v28  ;;  %v1086_v40 = vperm.slane %v1047_v28, %v1766_v9 }
0x1391   :  { %v1068_v48 = vsel %vm84_vm0, %v1064_v30, 0.0 }
0x1396   :  { %v1062_v36 = vpop.permute.xlu2 %1061 }
0x1397   :  { %v1090_v46 = vperm.slane %v1062_v36, %v1863_v35  ;;  %v1067_v8 = vmul.f32 %v2156_v34, %v1062_v36 }
0x1399   :  { %v1078_v22 = vsel %vm242_vm7, %v1067_v8, 0.0 }
0x13a7   :  { %v1052_v39 = vpop.permute.xlu1 %1051 }
0x13a8   :  { %v1057_v41 = vpop.permute.xlu0 %1056  ;;  %v1065_v44 = vmul.f32 %v2135_v58, %v1052_v39  ;;  %v1087_v45 = vperm.slane %v1052_v39, %v1863_v35 }
0x13a9   :  { %v1089_v12 = vperm.slane %v1057_v41, %v1766_v9  ;;  %v1066_v33 = vmul.f32 %v2150_v32, %v1057_v41 }
0x13aa   :  { %v1069_v49 = vsel %vm242_vm7, %v1065_v44, 0.0  ;;  %v1088_v50 = vsel %vm259_vm8, %v1087_v45, %v1086_v40  ;;  %v2164_v40 = vstv %s2161_s1 }
0x13ab   :  { %v1070_v52 = vadd.f32 %v1069_v49, %v1068_v48  ;;  %v1091_v53 = vsel %vm259_vm8, %v1090_v46, %v1089_v12  ;;  %v1077_v62 = vsel %vm84_vm0, %v1066_v33, 0.0 }
0x13ac   :  { %v1092_v55 = vsel %vm97_vm1, %v1091_v53, %v1088_v50  ;;  %v1079_v2 = vadd.f32 %v1078_v22, %v1077_v62 }
0x13ad   :  { %v1094_v57 = vsel %vm266_vm9, %v1092_v55, 0.0  ;;  %v1071_v38 = vrot.slane %v1070_v52, 4 }
0x13ae   :  { %1095 = vadd.xlane.f32.xlu2 %v1094_v57  ;;  %v1080_v23 = vrot.slane %v1079_v2, 4 }
0x13af   :  { %v1072_v24 = vadd.f32 %v1071_v38, %v1070_v52 }
0x13b0   :  { %v1081_v4 = vadd.f32 %v1080_v23, %v1079_v2 }
0x13b1   :  { %v1073_v37 = vrot.slane %v1072_v24, 2 }
0x13b2   :  { %v1082_v63 = vrot.slane %v1081_v4, 2 }
0x13b3   :  { %v1074_v1 = vadd.f32 %v1073_v37, %v1072_v24 }
0x13b4   :  { %v1083_v11 = vadd.f32 %v1082_v63, %v1081_v4 }
0x13b5   :  { %v1075_v18 = vrot.slane %v1074_v1, 1 }
0x13b6   :  { %v1084_v21 = vrot.slane %v1083_v11, 1 }
0x13b7   :  { %v1076_v30 = vadd.f32 %v1075_v18, %v1074_v1 }
0x13b8   :  { %v1085_v41 = vadd.f32 %v1084_v21, %v1083_v11 }
0x1421   :  { %v1096_v25 = vpop.xlane.xlu2 %1095 }
0x1422   :  { %1622 = vrcp.f32 %v1096_v25  ;;  %v1108_v17 = vand.u32 2147483648, %v1096_v25  ;;  %v1106_v19 = vand.u32 2147483647, %v1096_v25  ;;  %vm1102_vm13 = vweird.f32 %v1096_v25 }
0x1424   :  { %v1109_v28 = vor.u32 1.1754944e-38, %v1108_v17  ;;  %vm1107_vm15 = vcmp.eq.f32.partialorder %v1106_v19, 8.507059e+37 }
0x1428   :  { %v1623_v0 = vpop.eup %1622 }
0x1429   :  { %v1098_v54 = vmul.f32 %v1623_v0, %v1096_v25  ;;  %vm1103_vm12 = vweird.f32 %v1623_v0 }
0x142a   :  { %vm1104_vm14 = vmor %vm1102_vm13, %vm1103_vm12  ;;  %vm1474_vm13 = vcmask 523264  }
0x142b   :  { %v1099_v13 = vsub.f32 1.0, %v1098_v54 }
0x142d   :  { %v1100_v5 = vmul.f32 %v1623_v0, %v1099_v13 }
0x142f   :  { %v1101_v26 = vadd.f32 %v1623_v0, %v1100_v5 }
0x1431   :  { %v1105_v36 = vsel %vm1104_vm14, %v1623_v0, %v1101_v26  ;;  %vm1476_vm14 = vcmask 785408  }
0x1432   :  { %v1110_v39 = vsel %vm1107_vm15, %v1109_v28, %v1105_v36 }
0x1433   :  { %v1113_v44 = vrot.slane %v1110_v39, 1  ;;  %v1116_v45 = vmul.f32 %v1110_v39, %v1076_v30 }
0x1435   :  { %v1117_v46 = vmul.f32 %v1113_v44, %v1085_v41  ;;  %v1185_v12 = vmul.f32 %v2164_v40, %v1116_v45 }
0x1437   :  { %v1120_v48 = vrot.slane %v1117_v46, 7  ;;  %v1186_v49 = vmul.f32 %v2164_v40, %v1117_v46  ;;  %v2169_v50 = vadd.f32 %v1185_v12, %v2076_v59 }
0x1439   :  { %v2172_v52 = vsel %vm97_vm1, %v1120_v48, %v1116_v45  ;;  %v2175_v53 = vadd.f32 %v1186_v49, %v2082_v31 }
0x143a   :  { %1534 = vmatmul.msk.f32.vlgmr.msra.gmra.mxu3 %vm84_vm0, %v2172_v52 }
0x14bd   :  { %v1141_v55 = vpop.f32.mrf.mxu3 }
0x14be   :  { %v1142_v57 = vadd.f32 %v1926_v16, %v1141_v55  ;;  %v1165_v16 = vpop.permute.xlu1 %1164 }
0x14c0   :  { %v1144_v33 = vadd.f32 %v1142_v57, %v2099_v42 }
0x14c2   :  { %v1535_v8 = vmul.f32 -1.442695, %v1144_v33 }
0x14c4   :  { %1624 = vpow2.f32 %v1535_v8 }
0x14ca   :  { %v1625_v62 = vpop.eup %1624 }
0x14cb   :  { %v1148_v22 = vadd.f32 1.0, %v1625_v62 }
0x14cd   :  { %1626 = vrcp.f32 %v1148_v22  ;;  %v1160_v23 = vand.u32 2147483648, %v1148_v22  ;;  %v1158_v31 = vand.u32 2147483647, %v1148_v22  ;;  %vm1154_vm3 = vweird.f32 %v1148_v22 }
0x14cf   :  { %v1161_v4 = vor.u32 1.1754944e-38, %v1160_v23  ;;  %vm1159_vm5 = vcmp.eq.f32.partialorder %v1158_v31, 8.507059e+37 }
0x14d3   :  { %v1627_v59 = vpop.eup %1626 }
0x14d4   :  { %v1150_v2 = vmul.f32 %v1627_v59, %v1148_v22  ;;  %vm1155_vm2 = vweird.f32 %v1627_v59 }
0x14d5   :  { %vm1156_vm4 = vmor %vm1154_vm3, %vm1155_vm2 }
0x14d6   :  { %v1151_v38 = vsub.f32 1.0, %v1150_v2 }
0x14d8   :  { %v1152_v24 = vmul.f32 %v1627_v59, %v1151_v38 }
0x14da   :  { %v1153_v25 = vadd.f32 %v1627_v59, %v1152_v24 }
0x14dc   :  { %v1157_v37 = vsel %vm1156_vm4, %v1627_v59, %v1153_v25 }
0x14dd   :  { %v1162_v42 = vsel %vm1159_vm5, %v1161_v4, %v1157_v37 }
0x14de   :  { %v1167_v63 = vmul.f32 %v1165_v16, %v1162_v42  ;;  %v1174_v11 = vsub.f32 1.0, %v1162_v42  ;;  %v1180_v17 = vmul.f32 %v1162_v42, %v2091_v27 }
0x14e0   :  { %1169 = vrot.lane.b32.xlu0 %v1167_v63, %s1725_s11 }
0x1552   :  { %v1170_v0 = vpop.permute.xlu0 %1169 }
0x1553   :  { %v1172_v1 = vadd.f32 %v1170_v0, %v1142_v57 }
0x1555   :  { %1628 = vtanh.f32 %v1172_v1 }
0x155b   :  { %v1629_v54 = vpop.eup %1628 }
0x155c   :  { %1176 = vrot.lane.b32.xlu1 %v1629_v54, %s1723_s5 }
0x15ce   :  { %v1177_v13 = vpop.permute.xlu1 %1176 }
0x15cf   :  { %v1179_v18 = vmul.f32 %v1177_v13, %v1174_v11 }
0x15d1   :  { %v2184_v5 = vadd.f32 %v1180_v17, %v1179_v18 }
0x15d3   :  { %1201 = vrot.lane.b32.xlu0 %v2184_v5, %s1723_s5 }
0x1645   :  { %v1202_v19 = vpop.permute.xlu0 %1201 }
0x1646   :  { %1537 = vmatmul.msk.f32.vlgmr.msrb.gmra.mxu0 %vm84_vm0, %v1202_v19 }
0x16c3   :  { %v1222_v21 = vpop.f32.mrf.mxu0 }
0x16c4   :  { %v2190_v26 = vadd.f32 %v2096_v43, %v1222_v21 }
0x16c6   :  { %v1227_v28 = vperm.slane %v2190_v26, 0  ;;  %v1226_v39 = vrot.slane %v2190_v26, 1 }
0x16c8   :  { %v1232_v30 = vmul.f32 %v1227_v28, %v1839_v10  ;;  %v1231_v36 = vmul.f32 %v1227_v28, %v1835_v7  ;;  %v1228_v41 = vperm.slane %v1226_v39, 0 }
0x16ca   :  { %1241 = vrot.lane.b32.xlu0 %v1232_v30, %s1724_s10  ;;  %1239 = vrot.lane.b32.xlu1 %v1231_v36, %s1724_s10  ;;  %v1234_v44 = vmul.f32 %v1228_v41, %v1854_v20  ;;  %v1233_v45 = vmul.f32 %v1228_v41, %v1846_v15 }
0x16d2   :  { %1245 = vrot.lane.b32.xlu0 %v1234_v44, %s1724_s10  ;;  %1243 = vrot.lane.b32.xlu1 %v1233_v45, %s1724_s10 }
0x173c   :  { %v1242_v43 = vpop.permute.xlu0 %1241  ;;  %v1240_v46 = vpop.permute.xlu1 %1239 }
0x173d   :  { %v1254_v10 = vsel %vm242_vm7, %v1242_v43, 0.0  ;;  %v1251_v7 = vsel %vm84_vm0, %v1240_v46, 0.0 }
0x173e   :  { %1255 = vadd.xlane.f32.xlu2 %v1254_v10  ;;  %1252 = vadd.xlane.f32.xlu1 %v1251_v7 }
0x1744   :  { %v1246_v12 = vpop.permute.xlu0 %1245  ;;  %v1244_v48 = vpop.permute.xlu1 %1243 }
0x1745   :  { %v1260_v49 = vsel %vm242_vm7, %v1246_v12, 0.0  ;;  %v1257_v20 = vsel %vm84_vm0, %v1244_v48, 0.0 }
0x1746   :  { %1261 = vadd.xlane.f32.xlu2 %v1260_v49  ;;  %1258 = vadd.xlane.f32.xlu0 %v1257_v20 }
0x17b1   :  { %v1256_v15 = vpop.xlane.xlu2 %1255  ;;  %v1253_v55 = vpop.xlane.xlu1 %1252 }
0x17b2   :  { %v1268_v57 = vperm.slane %v1256_v15, %v1863_v35  ;;  %v1267_v33 = vperm.slane %v1253_v55, %v1766_v9 }
0x17b4   :  { %v1269_v2 = vsel %vm259_vm8, %v1268_v57, %v1267_v33 }
0x17b9   :  { %v1262_v8 = vpop.xlane.xlu2 %1261  ;;  %v1259_v62 = vpop.xlane.xlu0 %1258 }
0x17ba   :  { %v1271_v22 = vperm.slane %v1262_v8, %v1863_v35  ;;  %v1270_v59 = vperm.slane %v1259_v62, %v1766_v9 }
0x17bc   :  { %v1272_v38 = vsel %vm259_vm8, %v1271_v22, %v1270_v59 }
0x17bd   :  { %v1273_v23 = vsel %vm97_vm1, %v1272_v38, %v1269_v2 }
0x17be   :  { %v1275_v24 = vsel %vm266_vm9, %v1273_v23, -inf }
0x17bf   :  { %1276 = vmax.xlane.f32.xlu2 %v1275_v24 }
0x1832   :  { %v1277_v31 = vpop.xlane.xlu2 %1276 }
0x1833   :  { %v1279_v25 = vperm.slane %v1277_v31, 0  ;;  %v1280_v4 = vperm.slane %v1277_v31, 1 }
0x1835   :  { %v1283_v37 = vsub.f32 %v1253_v55, %v1279_v25  ;;  %v1284_v16 = vsub.f32 %v1256_v15, %v1279_v25  ;;  %v1285_v42 = vsub.f32 %v1259_v62, %v1280_v4  ;;  %v1286_v54 = vsub.f32 %v1262_v8, %v1280_v4 }
0x1837   :  { %v1287_v63 = vmul.f32 1.442695, %v1283_v37  ;;  %v1289_v0 = vmul.f32 1.442695, %v1284_v16  ;;  %v1291_v1 = vmul.f32 1.442695, %v1285_v42 }
0x1838   :  { %v1293_v11 = vmul.f32 1.442695, %v1286_v54 }
0x1839   :  { %1630 = vpow2.f32 %v1287_v63 }
0x183a   :  { %1632 = vpow2.f32 %v1289_v0  ;;  %v2241_v0 = vstv %s2238_s23 }
0x183b   :  { %1634 = vpow2.f32 %v1291_v1 }
0x183c   :  { %1636 = vpow2.f32 %v1293_v11 }
0x183f   :  { %v1631_v13 = vpop.eup %1630 }
0x1840   :  { %v1633_v17 = vpop.eup %1632  ;;  %1297 = vperm.xlu2 %1550, %v1631_v13  }
0x1841   :  { %v1635_v18 = vpop.eup %1634  ;;  %1302 = vperm.xlu1 %1549, %v1633_v17  }
0x1842   :  { %1307 = vperm.xlu0 %1551, %v1635_v18   ;;  %v1637_v19 = vpop.eup %1636 }
0x1848   :  { %1312 = vperm.xlu2 %1550, %v1637_v19  }
0x184a   :  { %1415 = vrot.lane.b32.xlu0 %v2190_v26, %s1725_s11 }
0x1852   :  { %436 = vrot.lane.b32.xlu0 %v1918_v14, %s1724_s10 }
0x185a   :  { %938 = vrot.lane.b32.xlu0 %v2079_v61, %s1724_s10 }
0x1862   :  { %1189 = vrot.lane.b32.xlu0 %v2172_v52, %s1724_s10 }
0x189a   :  { %v1298_v21 = vpop.permute.xlu2 %1297 }
0x189b   :  { %v1337_v36 = vperm.slane %v1298_v21, %v1766_v9  ;;  %v1315_v10 = vmul.f32 %v2128_v29, %v1298_v21 }
0x18a2   :  { %v1313_v28 = vpop.permute.xlu2 %1312 }
0x18a3   :  { %v1341_v44 = vperm.slane %v1313_v28, %v1863_v35  ;;  %v1318_v12 = vmul.f32 %v2156_v34, %v1313_v28 }
0x18a5   :  { %v1329_v20 = vsel %vm242_vm7, %v1318_v12, 0.0 }
0x18b3   :  { %v1303_v30 = vpop.permute.xlu1 %1302 }
0x18b4   :  { %v1308_v39 = vpop.permute.xlu0 %1307  ;;  %v1338_v41 = vperm.slane %v1303_v30, %v1863_v35  ;;  %v1316_v46 = vmul.f32 %v2135_v58, %v1303_v30 }
0x18b5   :  { %v1340_v45 = vperm.slane %v1308_v39, %v1766_v9  ;;  %v1317_v7 = vmul.f32 %v2150_v32, %v1308_v39  ;;  %v1319_v9 = vsel %vm84_vm0, %v1315_v10, 0.0 }
0x18b6   :  { %v1339_v14 = vsel %vm259_vm8, %v1338_v41, %v1337_v36  ;;  %v1320_v35 = vsel %vm242_vm7, %v1316_v46, 0.0 }
0x18b7   :  { %v1342_v43 = vsel %vm259_vm8, %v1341_v44, %v1340_v45  ;;  %v1328_v48 = vsel %vm84_vm0, %v1317_v7, 0.0  ;;  %v1321_v49 = vadd.f32 %v1320_v35, %v1319_v9  ;;  %v1651_v44 = vld [vmem:[#allocation6 + $0x50] ss:$0 sm:$0xff] }
0x18b8   :  { %v1343_v61 = vsel %vm97_vm1, %v1342_v43, %v1339_v14  ;;  %v1330_v15 = vadd.f32 %v1329_v20, %v1328_v48 }
0x18b9   :  { %v1345_v52 = vsel %vm266_vm9, %v1343_v61, 0.0  ;;  %v1322_v55 = vrot.slane %v1321_v49, 4 }
0x18ba   :  { %1346 = vadd.xlane.f32.xlu2 %v1345_v52  ;;  %v1331_v57 = vrot.slane %v1330_v15, 4 }
0x18bb   :  { %v1323_v33 = vadd.f32 %v1322_v55, %v1321_v49 }
0x18bc   :  { %v1332_v29 = vadd.f32 %v1331_v57, %v1330_v15  ;;  %v1416_v49 = vpop.permute.xlu0 %1415 }
0x18bd   :  { %v1324_v8 = vrot.slane %v1323_v33, 2 }
0x18be   :  { %v1333_v32 = vrot.slane %v1332_v29, 2 }
0x18bf   :  { %v1325_v34 = vadd.f32 %v1324_v8, %v1323_v33  ;;  %v77_v8 = vld [vmem:[#allocation6 + $0xc0] sm:$0xff] }
0x18c0   :  { %v1334_v59 = vadd.f32 %v1333_v32, %v1332_v29  ;;  %v78_v29 = vld [vmem:[#allocation6 + $0xc8] sm:$0xff] }
0x18c1   :  { %v1326_v23 = vrot.slane %v1325_v34, 1 }
0x18c2   :  { %v1335_v25 = vrot.slane %v1334_v59, 1 }
0x18c3   :  { %v1327_v16 = vadd.f32 %v1326_v23, %v1325_v34  ;;  %v76_v34 = vld [vmem:[#allocation6 + $0xb8] sm:$0xff]  ;;  %v681_v23 = vmul.f32 %v1994_v60, %v2016_v51 }
0x18c4   :  { %v1336_v1 = vadd.f32 %v1335_v25, %v1334_v59  ;;  %v437_v33 = vpop.permute.xlu0 %436  ;;  %v430_v25 = vmul.f32 %v1991_v6, %v1934_v56 }
0x18c5   :  { %v439_v59 = vsub.f32 %v1934_v56, %v437_v33 }
0x18cc   :  { %v939_v32 = vpop.permute.xlu0 %938 }
0x192d   :  { %v1347_v58 = vpop.xlane.xlu2 %1346 }
0x192e   :  { %1638 = vrcp.f32 %v1347_v58  ;;  %v1359_v38 = vand.u32 2147483648, %v1347_v58  ;;  %v1357_v31 = vand.u32 2147483647, %v1347_v58  ;;  %vm1353_vm8 = vweird.f32 %v1347_v58 }
0x1930   :  { %v1360_v37 = vor.u32 1.1754944e-38, %v1359_v38  ;;  %vm1358_vm6 = vcmp.eq.f32.partialorder %v1357_v31, 8.507059e+37  ;;  %v443_v38 = vmul.f32 %v437_v33, %v1934_v56  ;;  %v440_v31 = vand.u32 2147483647, %v439_v59  ;;  %v70_v33 = vld [vmem:[#allocation6 + $0x88] sm:$0xff] }
0x1934   :  { %v1639_v62 = vpop.eup %1638 }
0x1935   :  { %v1349_v22 = vmul.f32 %v1639_v62, %v1347_v58  ;;  %vm1354_vm7 = vweird.f32 %v1639_v62  ;;  %v79_v58 = vld [vmem:[#allocation6 + $0xd0] sm:$0xff] }
0x1936   :  { %vm1355_vm9 = vmor %vm1353_vm8, %vm1354_vm7  ;;  %1481 = vmatpush.msra.mxu2 %v79_v58  ;;  %v69_v58 = vld [vmem:[#allocation6 + $0x80] sm:$0xff] }
0x1937   :  { %v1350_v2 = vsub.f32 1.0, %v1349_v22  ;;  %v75_v22 = vld [vmem:[#allocation6 + $0xb0] sm:$0xff] }
0x1938   :  { %1482 = vmatpush.msra.mxu2 %v78_v29  ;;  %v67_v29 = vld [vmem:[#allocation6 + $0x70] sm:$0xff] }
0x1939   :  { %v1351_v24 = vmul.f32 %v1639_v62, %v1350_v2 }
0x193a   :  { %1483 = vmatpush.msra.mxu2 %v77_v8  ;;  %v66_v8 = vld [vmem:[#allocation6 + $0x68] sm:$0xff] }
0x193b   :  { %v1352_v4 = vadd.f32 %v1639_v62, %v1351_v24 }
0x193c   :  { %1484 = vmatpush.msra.mxu2 %v76_v34 }
0x193d   :  { %v1356_v42 = vsel %vm1355_vm9, %v1639_v62, %v1352_v4  ;;  %v932_v4 = vmul.f32 %v2071_v47, %v2091_v27 }
0x193e   :  { %v1361_v63 = vsel %vm1358_vm6, %v1360_v37, %v1356_v42  ;;  %1485 = vmatpush.msra.mxu2 %v75_v22  ;;  %v941_v37 = vsub.f32 %v2091_v27, %v939_v32 }
0x193f   :  { %v1364_v54 = vrot.slane %v1361_v63, 1  ;;  %v1367_v11 = vmul.f32 %v1361_v63, %v1327_v16  ;;  %v444_v63 = vmul.f32 %v443_v38, %v1991_v6 }
0x1941   :  { %v1368_v13 = vmul.f32 %v1364_v54, %v1336_v1  ;;  %v1436_v17 = vmul.f32 %v2241_v0, %v1367_v11  ;;  %v1190_v1 = vpop.permute.xlu0 %1189 }
0x1943   :  { %v1371_v18 = vrot.slane %v1368_v13, 7  ;;  %v1437_v19 = vmul.f32 %v2241_v0, %v1368_v13  ;;  %v1438_v21 = vadd.f32 %v1436_v17, %v2169_v50  ;;  %v945_v13 = vmul.f32 %v939_v32, %v2091_v27  ;;  %v64_v32 = vld [vmem:[#allocation6 + $0x58] sm:$0xff] }
0x1945   :  { %v1372_v28 = vsel %vm97_vm1, %v1371_v18, %v1367_v11  ;;  %v1439_v30 = vadd.f32 %v1437_v19, %v2175_v53  ;;  %v682_v11 = vadd.f32 %v681_v23, %v430_v25  ;;  %v441_v19 = vmul.f32 %v440_v31, %v1991_v6 }
0x1946   :  { %1538 = vmatmul.msk.f32.vlgmr.msra.gmra.mxu1 %vm84_vm0, %v1372_v28  ;;  %v1478_v31 = vstv %s1453_s26 }
0x1947   :  { %v1460_v36 = vrot.slane %v1439_v30, 7  ;;  %v1192_v30 = vsub.f32 %v2184_v5, %v1190_v1 }
0x1949   :  { %v2250_v39 = vsel %vm97_vm1, %v1460_v36, %v1438_v21  ;;  %v933_v21 = vadd.f32 %v932_v4, %v682_v11 }
0x19c3   :  { %v1392_v41 = vpop.f32.mrf.mxu1 }
0x19c4   :  { %v1393_v45 = vadd.f32 %v1651_v44, %v1392_v41 }
0x19c6   :  { %v1395_v14 = vadd.f32 %v1393_v45, %v2190_v26 }
0x19c8   :  { %v1539_v43 = vmul.f32 -1.442695, %v1395_v14  ;;  %v1196_v14 = vmul.f32 %v1190_v1, %v2184_v5 }
0x19ca   :  { %1640 = vpow2.f32 %v1539_v43 }
0x19d0   :  { %v1641_v61 = vpop.eup %1640 }
0x19d1   :  { %v1399_v52 = vadd.f32 1.0, %v1641_v61  ;;  %v1193_v61 = vand.u32 2147483647, %v1192_v30 }
0x19d3   :  { %1642 = vrcp.f32 %v1399_v52  ;;  %v1411_v53 = vand.u32 2147483648, %v1399_v52  ;;  %v1409_v12 = vand.u32 2147483647, %v1399_v52  ;;  %vm1405_vm1 = vweird.f32 %v1399_v52 }
0x19d5   :  { %v1412_v9 = vor.u32 1.1754944e-38, %v1411_v53  ;;  %vm1410_vm12 = vcmp.eq.f32.partialorder %v1409_v12, 8.507059e+37  ;;  %v1194_v12 = vmul.f32 %v1193_v61, %v2164_v40 }
0x19d9   :  { %v1643_v50 = vpop.eup %1642 }
0x19da   :  { %v1401_v46 = vmul.f32 %v1643_v50, %v1399_v52  ;;  %vm1406_vm10 = vweird.f32 %v1643_v50 }
0x19db   :  { %vm1407_vm11 = vmor %vm1405_vm1, %vm1406_vm10 }
0x19dc   :  { %v1402_v10 = vsub.f32 1.0, %v1401_v46  ;;  %v1197_v46 = vmul.f32 %v1196_v14, %v2164_v40 }
0x19de   :  { %v1403_v7 = vmul.f32 %v1643_v50, %v1402_v10 }
0x19e0   :  { %v1404_v35 = vadd.f32 %v1643_v50, %v1403_v7 }
0x19e2   :  { %v1408_v48 = vsel %vm1407_vm11, %v1643_v50, %v1404_v35 }
0x19e3   :  { %v1413_v26 = vsel %vm1410_vm12, %v1412_v9, %v1408_v48 }
0x19e4   :  { %v1418_v20 = vmul.f32 %v1416_v49, %v1413_v26  ;;  %v1425_v42 = vsub.f32 1.0, %v1413_v26  ;;  %v1431_v17 = vmul.f32 %v1413_v26, %v2184_v5 }
0x19e6   :  { %1420 = vrot.lane.b32.xlu1 %v1418_v20, %s1725_s11 }
0x19ee   :  { %687 = vrot.lane.b32.xlu1 %v2005_v3, %s1724_s10 }
0x1a58   :  { %v1421_v15 = vpop.permute.xlu1 %1420 }
0x1a59   :  { %v1423_v55 = vadd.f32 %v1421_v15, %v1393_v45  ;;  %v946_v45 = vmul.f32 %v945_v13, %v2071_v47  ;;  %v74_v15 = vld [vmem:[#allocation6 + $0xa8] sm:$0xff] }
0x1a5a   :  { %1486 = vmatpush.msra.mxu2 %v74_v15 }
0x1a5b   :  { %1644 = vtanh.f32 %v1423_v55  ;;  %v73_v55 = vld [vmem:[#allocation6 + $0xa0] sm:$0xff] }
0x1a5c   :  { %1487 = vmatpush.msra.mxu2 %v73_v55 }
0x1a60   :  { %v688_v62 = vpop.permute.xlu1 %687 }
0x1a61   :  { %v1645_v57 = vpop.eup %1644  ;;  %v690_v3 = vsub.f32 %v2016_v51, %v688_v62  ;;  %v694_v2 = vmul.f32 %v688_v62, %v2016_v51  ;;  %v1183_v51 = vmul.f32 %v2164_v40, %v2184_v5  ;;  %v71_v40 = vld [vmem:[#allocation6 + $0x90] sm:$0xff] }
0x1a62   :  { %1427 = vrot.lane.b32.xlu1 %v1645_v57, %s1723_s5  ;;  %v72_v57 = vld [vmem:[#allocation6 + $0x98] sm:$0xff] }
0x1a63   :  { %v691_v24 = vand.u32 2147483647, %v690_v3  ;;  %v695_v16 = vmul.f32 %v694_v2, %v1994_v60  ;;  %v1184_v44 = vadd.f32 %v1183_v51, %v933_v21  ;;  %1488 = vmatpush.msra.mxu2 %v72_v57 }
0x1a65   :  { %v692_v56 = vmul.f32 %v691_v24, %v1994_v60  ;;  %v696_v36 = vadd.f32 %v695_v16, %v444_v63  ;;  %1489 = vmatpush.msra.mxu2 %v71_v40  ;;  %v80_v24 = vld [vmem:[#allocation6 + $0xd8] sm:$0x1] }
0x1a66   :  { %v1479_v25 = vmul.f32 %v1478_v31, %v80_v24 }
0x1a67   :  { %v693_v43 = vadd.f32 %v692_v56, %v441_v19  ;;  %v947_v52 = vadd.f32 %v946_v45, %v696_v36  ;;  %1490 = vmatpush.msra.mxu2 %v70_v33 }
0x1a68   :  { %v1480_v4 = vperm.slane %v1479_v25, 0 }
0x1a69   :  { %v1198_v9 = vadd.f32 %v1197_v46, %v947_v52  ;;  %1491 = vmatpush.msra.mxu2 %v69_v58 }
0x1a6a   :  { %1440 = vrot.lane.b32.xlu1 %v1372_v28, %s1724_s10  ;;  %v942_v28 = vand.u32 2147483647, %v941_v37 }
0x1a6c   :  { %v943_v60 = vmul.f32 %v942_v28, %v2071_v47 }
0x1a6e   :  { %v944_v10 = vadd.f32 %v943_v60, %v693_v43 }
0x1a70   :  { %v1195_v49 = vadd.f32 %v1194_v12, %v944_v10 }
0x1ad4   :  { %v1428_v54 = vpop.permute.xlu1 %1427 }
0x1ad5   :  { %v1430_v18 = vmul.f32 %v1428_v54, %v1425_v42 }
0x1ad7   :  { %v1432_v41 = vadd.f32 %v1431_v17, %v1430_v18 }
0x1ad9   :  { %v1434_v27 = vmul.f32 %v2241_v0, %v1432_v41 }
0x1adb   :  { %v1435_v50 = vadd.f32 %v1434_v27, %v1184_v44 }
0x1adc   :  { %v1441_v6 = vpop.permute.xlu1 %1440 }
0x1add   :  { %v1443_v53 = vsub.f32 %v1432_v41, %v1441_v6  ;;  %v1447_v7 = vmul.f32 %v1441_v6, %v1432_v41  ;;  %1455 = vrot.lane.b32.xlu0 %v1435_v50, %s1723_s5 }
0x1adf   :  { %v1444_v35 = vand.u32 2147483647, %v1443_v53  ;;  %v1448_v5 = vmul.f32 %v1447_v7, %v2241_v0 }
0x1ae1   :  { %v1445_v48 = vmul.f32 %v1444_v35, %v2241_v0  ;;  %v1449_v47 = vadd.f32 %v1448_v5, %v1198_v9  ;;  %v68_v0 = vld [vmem:[#allocation6 + $0x78] sm:$0xff] }
0x1ae2   :  { %1492 = vmatpush.msra.mxu2 %v68_v0 }
0x1ae3   :  { %1470 = vrot.lane.b32.xlu1 %v1449_v47, %s1725_s11  ;;  %v1446_v26 = vadd.f32 %v1445_v48, %v1195_v49 }
0x1ae4   :  { %1493 = vmatpush.msra.mxu2 %v67_v29 }
0x1ae5   :  { %v1552_v20 = vpack.i.bf16 %v1446_v26, %v2250_v39  ;;  %v65_v39 = vld [vmem:[#allocation6 + $0x60] sm:$0xff] }
0x1ae6   :  { %1494 = vmatpush.msra.mxu2 %v66_v8 }
0x1ae7   :  { %1553 = vrot.lane.b32.xlu2 %v1552_v20, %s1724_s10 }
0x1ae8   :  { %1495 = vmatpush.msra.mxu2 %v65_v39 }
0x1aea   :  { %1496 = vmatpush.msra.mxu2 %v64_v32 }
0x1b41   :  { %v1554_v62 = vpop.permute.xlu2 %1553 }
0x1b42   :  { %v1555_v3 = vunpack.i.l.bf16 %v1554_v62  ;;  %v1556_v59 = vunpack.i.h.bf16 %v1554_v62 }
0x1b4f   :  { %v1456_v34 = vpop.permute.xlu0 %1455 }
0x1b50   :  { %v1473_v22 = vsel %vm84_vm0, %v1456_v34, %v1555_v3  ;;  %vm1501_vm0 = vcmask 25600  }
0x1b51   :  { %v1475_v38 = vsel %vm1474_vm13, %v1473_v22, %v1556_v59 }
0x1b55   :  { %v1471_v2 = vpop.permute.xlu1 %1470 }
0x1b56   :  { %v1477_v23 = vsel %vm1476_vm14, %v1475_v38, %v1471_v2 }
0x1b57   :  { %1497 = vmatmul.f32.vlgmr.msra.gmra.mxu2 %v1477_v23 }
0x1bda   :  { %v1498_v37 = vpop.f32.mrf.mxu2 }
0x1bdb   :  { %v1499_v16 = vadd.f32 %v1498_v37, %v1480_v4 }
0x1bdd   :  { %1502 = vst.msk [vmem:[#allocation7] sm:$0x3] %vm1501_vm0, %v1499_v16 }
0x1bde   :  { %1513 = dma.vmem_to_hbm [thread:$0]  %s1509_s27, 32, %s1511_s29, [#allocation4]  }
0x1bdf   :  { %1716 = dma.done.wait [#allocation4], 32  }
0x1be0   :  { %1717 = vsyncadd [#allocation4], 4294967264 }
0x1be1   :  { %1518 = vsyncpa [#allocation3], 1 }
0x1be2   :  { %1519 = vsyncpa [#allocation4], 1 }
0x1be3   :  { %1520 = vsyncpa [#allocation5], 1 }

</bundles_post_ra>
